<compile_context>
chip_gen: v6e
topology: v6e:2x2x1
jax: 0.10.0
libtpu: 0.0.40
codegen_flags: <defaults>
</compile_context>

<pallas_src>
import functools

import jax
import jax.numpy as jnp
from jax.experimental import pallas as pl
from jax.experimental.pallas import tpu as pltpu


_PARAM_ORDER = ("wqkv", "bqkv", "wo", "bo", "w1", "b1", "w2", "b2",
                "g1", "be1", "g2", "be2")


def _round_up(x, m):
    return ((x + m - 1) // m) * m


def _masked_layer_norm(x, gamma, beta, mask, inv_n, eps=1e-5):
    """LayerNorm over the real (unpadded) embed columns; padded cols stay 0."""
    xm = jnp.where(mask, x, 0.0)
    mean = jnp.sum(xm, axis=-1, keepdims=True) * inv_n
    c = jnp.where(mask, x - mean, 0.0)
    var = jnp.sum(c * c, axis=-1, keepdims=True) * inv_n
    return c * jax.lax.rsqrt(var + eps) * gamma + beta


def fused_transformer_kernel(x_ref, wqkv_ref, bqkv_ref, wo_ref, bo_ref,
                             w1_ref, b1_ref, w2_ref, b2_ref,
                             g1_ref, be1_ref, g2_ref, be2_ref,
                             o_ref, *, num_heads, e_real, weights_resident):
    l = pl.program_id(1)
    li = l if weights_resident else 0      # VMEM-resident weights vs per-layer stream

    # Load the activation into the f32 output block once per batch tile; o_ref's
    # block index is constant along L so it stays VMEM-resident (layer carry).
    @pl.when(l == 0)
    def _():
        o_ref[...] = x_ref[...]

    TB, S, Ep = o_ref.shape
    N = TB * S
    E = e_real
    H = num_heads
    Dh = E // H
    bf16 = jnp.bfloat16

    x = o_ref[...].reshape(N, Ep)          # (N, Ep) f32 carry

    col_mask = jax.lax.broadcasted_iota(jnp.int32, (1, Ep), 1) < E
    inv_e = 1.0 / float(E)

    # ---- packed qkv projection: one (N,Ep)@(Ep,Wq3) bf16 MXU matmul ----
    qkv = jnp.dot(x.astype(bf16), wqkv_ref[li],
                  preferred_element_type=jnp.float32) + bqkv_ref[li]   # (N, Wq3)
    qkv3 = qkv.reshape(TB, S, qkv.shape[-1])                           # (TB,S,Wq3)

    # ---- multi-head attention (per-head Dh-wide views; batch rows never mix) --
    # TODO(synk): switch to lax.fori_loop over heads + flash query tiling for
    # large H / S; static unroll is fine at H=4, S=8.
    head_outs = []
    for h in range(H):
        c0, c1 = h * Dh, (h + 1) * Dh
        q_h = qkv3[:, :, c0:c1].astype(bf16)                 # (TB,S,Dh)
        k_h = qkv3[:, :, E + c0:E + c1].astype(bf16)
        v_h = qkv3[:, :, 2 * E + c0:2 * E + c1].astype(bf16)
        s = jnp.einsum("bqd,bkd->bqk", q_h, k_h,
                       preferred_element_type=jnp.float32)   # (TB,S,S) f32
        s = s - jnp.max(s, axis=-1, keepdims=True)
        p = jnp.exp(s)
        p = p * pl.reciprocal(jnp.sum(p, axis=-1, keepdims=True), approx=True)
        ho = jnp.einsum("bqk,bkd->bqd", p.astype(bf16), v_h,
                        preferred_element_type=jnp.float32)  # (TB,S,Dh) f32
        head_outs.append(ho)
    if Ep > E:
        head_outs.append(jnp.zeros((TB, S, Ep - E), jnp.float32))
    concat = jnp.concatenate(head_outs, axis=-1).reshape(N, Ep)

    # ---- single W_o matmul over the concatenated heads ----
    attn = jnp.dot(concat.astype(bf16), wo_ref[li],
                   preferred_element_type=jnp.float32) + bo_ref[li]

    # TODO(synk): dropout layers are identity here (eval-mode semantics).
    # ---- residual + LayerNorm 1 ----
    y = _masked_layer_norm(x + attn, g1_ref[li], be1_ref[li], col_mask, inv_e)

    # ---- feed-forward (ReLU), bf16 operands / f32 accumulation ----
    hdn = jnp.dot(y.astype(bf16), w1_ref[li],
                  preferred_element_type=jnp.float32) + b1_ref[li]
    hdn = jnp.maximum(hdn, 0.0)
    ff = jnp.dot(hdn.astype(bf16), w2_ref[li],
                 preferred_element_type=jnp.float32) + b2_ref[li]

    # ---- residual + LayerNorm 2 ----
    z = _masked_layer_norm(y + ff, g2_ref[li], be2_ref[li], col_mask, inv_e)

    # f32 carry for the next layer; only written to HBM when the batch tile
    # advances.  (Output dtype is forced to f32 so no per-layer rounding.)
    o_ref[...] = z.reshape(TB, S, Ep)


def pack_layer_params(p, E, H, Hd, Ep, Wq3, Hp):
    """Host-side re-layout of one PyTorch-layout layer:
       - transpose every weight to (in, out) so the kernel never transposes,
       - pack q|k|v contiguously (no per-head 128-lane padding) and pad totals
         to 128-lane multiples,
       - fold 1/sqrt(Dh) into the q projection weight and bias,
       - matmul weights stored in bf16 (f32 accumulation in-kernel); biases and
         LayerNorm params stay f32; padded columns are exactly zero."""
    f32, bf16 = jnp.float32, jnp.bfloat16
    Dh = E // H
    scale = 1.0 / (Dh ** 0.5)

    wqkv = p["wqkv"].astype(f32)                      # (3E, E): rows q|k|v
    bqkv = p["bqkv"].reshape(3 * E).astype(f32)

    wq = wqkv[:E].T * scale                           # (E, E), scale folded
    wk = wqkv[E:2 * E].T
    wv = wqkv[2 * E:].T
    w_packed = jnp.concatenate([wq, wk, wv], axis=1)  # (E, 3E)
    wqkv_t = jnp.zeros((Ep, Wq3), f32).at[:E, :3 * E].set(w_packed)

    b_packed = jnp.concatenate([bqkv[:E] * scale, bqkv[E:2 * E], bqkv[2 * E:]])
    bqkv_p = jnp.zeros((1, Wq3), f32).at[0, :3 * E].set(b_packed)

    wo_t = jnp.zeros((Ep, Ep), f32).at[:E, :E].set(p["wo"].astype(f32).T)
    bo_p = jnp.zeros((1, Ep), f32).at[0, :E].set(p["bo"].reshape(E))

    w1_t = jnp.zeros((Ep, Hp), f32).at[:E, :Hd].set(p["w1"].astype(f32).T)
    b1_p = jnp.zeros((1, Hp), f32).at[0, :Hd].set(p["b1"].reshape(Hd))
    w2_t = jnp.zeros((Hp, Ep), f32).at[:Hd, :E].set(p["w2"].astype(f32).T)
    b2_p = jnp.zeros((1, Ep), f32).at[0, :E].set(p["b2"].reshape(E))

    def pad_vec(v):                                   # LN params padded with ZEROS
        return jnp.zeros((1, Ep), f32).at[0, :E].set(v.reshape(E))

    return dict(wqkv=wqkv_t.astype(bf16), bqkv=bqkv_p,
                wo=wo_t.astype(bf16), bo=bo_p,
                w1=w1_t.astype(bf16), b1=b1_p,
                w2=w2_t.astype(bf16), b2=b2_p,
                g1=pad_vec(p["g1"]), be1=pad_vec(p["be1"]),
                g2=pad_vec(p["g2"]), be2=pad_vec(p["be2"]))


def self_attention_transformer(x, layer_params, num_heads):
    """x: (B, S, E) -> (B, S, E); layer_params: list of PyTorch-layout dicts."""
    B, S, E = x.shape
    L = len(layer_params)
    H = num_heads
    assert E % H == 0
    Dh = E // H
    Hd = layer_params[0]["w1"].shape[0]

    Ep = _round_up(E, 128)                  # residual-stream embed, lane-dense
    Wq3 = _round_up(3 * E, 128)             # packed q|k|v projection width
    Hp = _round_up(Hd, 128)                 # FFN hidden, lane-dense

    # Batch tile: target ~256 MXU rows (v6e/v7x) but keep >=2 parallel grid
    # blocks when B allows so both v7x TensorCores are used.
    TB = max(1, min(B, max(1, 256 // max(S, 1))))
    while TB > 1 and pl.cdiv(B, TB) < 2:
        TB = max(1, TB // 2)
    NB = pl.cdiv(B, TB)
    B_pad = NB * TB

    packed = [pack_layer_params(p, E, H, Hd, Ep, Wq3, Hp) for p in layer_params]
    stacked = {n: jnp.stack([pp[n] for pp in packed], axis=0) for n in _PARAM_ORDER}

    x_pad = jnp.zeros((B_pad, S, Ep), jnp.float32).at[:B, :, :E].set(
        x.astype(jnp.float32))

    w_bytes = sum(int(stacked[n].size) * stacked[n].dtype.itemsize
                  for n in _PARAM_ORDER)
    weights_resident = w_bytes <= 12 * 1024 * 1024   # whole stack fits VMEM

    kernel = functools.partial(fused_transformer_kernel, num_heads=H, e_real=E,
                               weights_resident=weights_resident)

    in_specs = [pl.BlockSpec((TB, S, Ep), lambda b, l: (b, 0, 0))]   # activations
    for name in _PARAM_ORDER:
        shape = stacked[name].shape
        if weights_resident:
            # Block covers all L with a constant index_map -> fetched once,
            # resident across the whole grid.
            in_specs.append(pl.BlockSpec(shape, lambda b, l: (0, 0, 0)))
        else:
            in_specs.append(pl.BlockSpec((1,) + shape[1:], lambda b, l: (l, 0, 0)))

    # Advisory cost estimate for XLA scheduling.
    Ntot = B_pad * S
    flops = L * (2 * Ntot * Ep * Wq3 + 2 * Ntot * Ep * Ep
                 + 4 * Ntot * Ep * Hp + H * 4 * Ntot * S * Dh)
    transcendentals = L * (H * Ntot * S + 4 * Ntot)
    bytes_accessed = 8 * Ntot * Ep + (w_bytes if weights_resident else NB * w_bytes)

    out = pl.pallas_call(
        kernel,
        out_shape=jax.ShapeDtypeStruct((B_pad, S, Ep), jnp.float32),
        grid_spec=pltpu.PrefetchScalarGridSpec(
            num_scalar_prefetch=0,
            grid=(NB, L),                         # L innermost: layer carry in VMEM
            in_specs=in_specs,
            out_specs=pl.BlockSpec((TB, S, Ep), lambda b, l: (b, 0, 0)),
        ),
        compiler_params=pltpu.CompilerParams(
            dimension_semantics=("parallel", "arbitrary"),
            vmem_limit_bytes=48 * 1024 * 1024),   # fits v7x's 64 MiB physical VMEM
        cost_estimate=pl.CostEstimate(
            flops=flops, transcendentals=transcendentals,
            bytes_accessed=bytes_accessed),
    )(x_pad, *(stacked[name] for name in _PARAM_ORDER))

    return out[:B, :, :E].astype(x.dtype)


def init_layer_params(key, input_dim, hidden_dim):
    """Deterministic synthetic weights in PyTorch nn.TransformerEncoderLayer layout."""
    E, Hd = input_dim, hidden_dim
    ks = jax.random.split(key, 8)
    f32 = jnp.float32
    return {
        "wqkv": jax.random.normal(ks[0], (3 * E, E), f32) * 0.02,  # in_proj_weight
        "bqkv": jax.random.normal(ks[1], (3 * E,), f32) * 0.01,
        "wo": jax.random.normal(ks[2], (E, E), f32) * 0.02,        # out_proj
        "bo": jax.random.normal(ks[3], (E,), f32) * 0.01,
        "w1": jax.random.normal(ks[4], (Hd, E), f32) * 0.02,       # linear1
        "b1": jax.random.normal(ks[5], (Hd,), f32) * 0.01,
        "w2": jax.random.normal(ks[6], (E, Hd), f32) * 0.02,       # linear2
        "b2": jax.random.normal(ks[7], (E,), f32) * 0.01,
        "g1": jnp.ones((E,), f32), "be1": jnp.zeros((E,), f32),
        "g2": jnp.ones((E,), f32), "be2": jnp.zeros((E,), f32),
    }


def encoder_layer_ref(x, p, num_heads, eps=1e-5):
    """Pure-JAX reference matching PyTorch eval-mode TransformerEncoderLayer."""
    B, S, E = x.shape
    H = num_heads
    Dh = E // H
    qkv = jnp.einsum("bse,fe->bsf", x, p["wqkv"]) + p["bqkv"]
    q, k, v = qkv[..., :E], qkv[..., E:2 * E], qkv[..., 2 * E:]

    def heads(t):
        return t.reshape(B, S, H, Dh).transpose(0, 2, 1, 3)

    qh = heads(q) * (1.0 / (Dh ** 0.5))
    kh, vh = heads(k), heads(v)
    s = jnp.einsum("bhqd,bhkd->bhqk", qh, kh)
    pr = jax.nn.softmax(s, axis=-1)
    o = jnp.einsum("bhqk,bhkd->bhqd", pr, vh).transpose(0, 2, 1, 3).reshape(B, S, E)
    attn = jnp.einsum("bse,fe->bsf", o, p["wo"]) + p["bo"]

    def ln(t, g, b):
        m = jnp.mean(t, axis=-1, keepdims=True)
        var = jnp.mean((t - m) ** 2, axis=-1, keepdims=True)
        return (t - m) / jnp.sqrt(var + eps) * g + b

    y = ln(x + attn, p["g1"], p["be1"])
    hdn = jax.nn.relu(jnp.einsum("bse,fe->bsf", y, p["w1"]) + p["b1"])
    ff = jnp.einsum("bsf,ef->bse", hdn, p["w2"]) + p["b2"]
    return ln(y + ff, p["g2"], p["be2"])


if __name__ == "__main__":
    batch, seq, input_dim, num_heads, hidden_dim, num_layers = 2, 8, 32, 4, 64, 2

    key = jax.random.PRNGKey(0)
    kx, kp = jax.random.split(key)
    x = jax.random.normal(kx, (batch, seq, input_dim), jnp.float32)
    layer_keys = jax.random.split(kp, num_layers)
    layer_params = [init_layer_params(k, input_dim, hidden_dim) for k in layer_keys]

    out = self_attention_transformer(x, layer_params, num_heads)
    out = jax.block_until_ready(out)
    assert out.shape == (batch, seq, input_dim)
    assert bool(jnp.all(jnp.isfinite(out)))

    ref = x
    for p in layer_params:
        ref = encoder_layer_ref(ref, p, num_heads)
    max_err = float(jnp.max(jnp.abs(out - ref)))
    assert max_err < 5e-2, f"kernel mismatch vs reference: {max_err}"
    print("KERNEL_OK")
</pallas_src>

<mosaic_0001>
module attributes {stable_mosaic.version = 11 : i64} {
  func.func @fused_transformer_kernel(%arg0: i32, %arg1: i32, %arg2: memref<1x8x128xf32, #tpu.memory_space<vmem>>, %arg3: memref<2x128x128xbf16, #tpu.memory_space<vmem>>, %arg4: memref<2x1x128xf32, #tpu.memory_space<vmem>>, %arg5: memref<2x128x128xbf16, #tpu.memory_space<vmem>>, %arg6: memref<2x1x128xf32, #tpu.memory_space<vmem>>, %arg7: memref<2x128x128xbf16, #tpu.memory_space<vmem>>, %arg8: memref<2x1x128xf32, #tpu.memory_space<vmem>>, %arg9: memref<2x128x128xbf16, #tpu.memory_space<vmem>>, %arg10: memref<2x1x128xf32, #tpu.memory_space<vmem>>, %arg11: memref<2x1x128xf32, #tpu.memory_space<vmem>>, %arg12: memref<2x1x128xf32, #tpu.memory_space<vmem>>, %arg13: memref<2x1x128xf32, #tpu.memory_space<vmem>>, %arg14: memref<2x1x128xf32, #tpu.memory_space<vmem>>, %arg15: memref<1x8x128xf32, #tpu.memory_space<vmem>>) attributes {dimension_semantics = [#tpu.dimension_semantics<parallel>, #tpu.dimension_semantics<arbitrary>], iteration_bounds = array<i64: 2, 2>, scalar_prefetch = 0 : i64, scratch_operands = 0 : i64, tpu.core_type = #tpu.core_type<tc>, window_params = [{transform_indices = @transform_0, window_bounds = array<i64: 1, 8, 128>}, {pipeline_mode = #tpu.pipeline_mode<synchronous>, transform_indices = @transform_1, window_bounds = array<i64: 2, 128, 128>}, {pipeline_mode = #tpu.pipeline_mode<synchronous>, transform_indices = @transform_2, window_bounds = array<i64: 2, 1, 128>}, {pipeline_mode = #tpu.pipeline_mode<synchronous>, transform_indices = @transform_3, window_bounds = array<i64: 2, 128, 128>}, {pipeline_mode = #tpu.pipeline_mode<synchronous>, transform_indices = @transform_4, window_bounds = array<i64: 2, 1, 128>}, {pipeline_mode = #tpu.pipeline_mode<synchronous>, transform_indices = @transform_5, window_bounds = array<i64: 2, 128, 128>}, {pipeline_mode = #tpu.pipeline_mode<synchronous>, transform_indices = @transform_6, window_bounds = array<i64: 2, 1, 128>}, {pipeline_mode = #tpu.pipeline_mode<synchronous>, transform_indices = @transform_7, window_bounds = array<i64: 2, 128, 128>}, {pipeline_mode = #tpu.pipeline_mode<synchronous>, transform_indices = @transform_8, window_bounds = array<i64: 2, 1, 128>}, {pipeline_mode = #tpu.pipeline_mode<synchronous>, transform_indices = @transform_9, window_bounds = array<i64: 2, 1, 128>}, {pipeline_mode = #tpu.pipeline_mode<synchronous>, transform_indices = @transform_10, window_bounds = array<i64: 2, 1, 128>}, {pipeline_mode = #tpu.pipeline_mode<synchronous>, transform_indices = @transform_11, window_bounds = array<i64: 2, 1, 128>}, {pipeline_mode = #tpu.pipeline_mode<synchronous>, transform_indices = @transform_12, window_bounds = array<i64: 2, 1, 128>}, {transform_indices = @transform_13, window_bounds = array<i64: 1, 8, 128>}]} {
    %c0_i32 = arith.constant 0 : i32
    %0 = arith.cmpi eq, %arg1, %c0_i32 : i32
    %1 = arith.extui %0 : i1 to i32
    %c0_i32_0 = arith.constant 0 : i32
    %2 = arith.cmpi ne, %1, %c0_i32_0 : i32
    scf.if %2 {
      %c0_65 = arith.constant 0 : index
      %c0_66 = arith.constant 0 : index
      %c0_67 = arith.constant 0 : index
      %202 = vector.load %arg2[%c0_65, %c0_66, %c0_67] : memref<1x8x128xf32, #tpu.memory_space<vmem>>, vector<1x8x128xf32>
      %c0_68 = arith.constant 0 : index
      %c0_69 = arith.constant 0 : index
      %c0_70 = arith.constant 0 : index
      %203 = vector.load %arg15[%c0_68, %c0_69, %c0_70] : memref<1x8x128xf32, #tpu.memory_space<vmem>>, vector<1x8x128xf32>
      tpu.vector_store %arg15[%c0_68, %c0_69, %c0_70], %202 {strides = array<i32>} : memref<1x8x128xf32, #tpu.memory_space<vmem>>, vector<1x8x128xf32>,
    } else {
    }
    %c0 = arith.constant 0 : index
    %c0_1 = arith.constant 0 : index
    %c0_2 = arith.constant 0 : index
    %3 = vector.load %arg15[%c0, %c0_1, %c0_2] : memref<1x8x128xf32, #tpu.memory_space<vmem>>, vector<1x8x128xf32>
    %4 = vector.shape_cast %3 : vector<1x8x128xf32> to vector<8x128xf32>
    %5 = tpu.iota {dimensions = array<i32: 1>} : vector<1x128xi32>
    %c32_i32 = arith.constant 32 : i32
    %6 = vector.broadcast %c32_i32 : i32 to vector<1x128xi32>
    %7 = arith.cmpi slt, %5, %6 : vector<1x128xi32>
    %8 = arith.truncf %4 : vector<8x128xf32> to vector<8x128xbf16>
    %9 = arith.index_cast %arg1 : i32 to index
    %c0_3 = arith.constant 0 : index
    %c0_4 = arith.constant 0 : index
    %10 = vector.load %arg3[%9, %c0_3, %c0_4] : memref<2x128x128xbf16, #tpu.memory_space<vmem>>, vector<1x128x128xbf16>
    %11 = vector.shape_cast %10 : vector<1x128x128xbf16> to vector<128x128xbf16>
    %cst = arith.constant dense<0.000000e+00> : vector<8x128xf32>
    %12 = tpu.matmul %8, %11, %cst {dimension_numbers = #tpu.dot_dimension_numbers<[1], [0], [0], [1], [0, 0, 1, 1], [], []>} : vector<8x128xbf16>, vector<128x128xbf16>, vector<8x128xf32> -> vector<8x128xf32>
    %13 = arith.index_cast %arg1 : i32 to index
    %c0_5 = arith.constant 0 : index
    %c0_6 = arith.constant 0 : index
    %14 = vector.load %arg4[%13, %c0_5, %c0_6] : memref<2x1x128xf32, #tpu.memory_space<vmem>>, vector<1x1x128xf32>
    %15 = vector.shape_cast %14 : vector<1x1x128xf32> to vector<1x128xf32>
    %16 = vector.broadcast %15 : vector<1x128xf32> to vector<8x128xf32>
    %17 = arith.addf %12, %16 : vector<8x128xf32>
    %18 = vector.shape_cast %17 : vector<8x128xf32> to vector<1x8x128xf32>
    %19 = vector.extract_strided_slice %18 {offsets = [0, 0, 0], sizes = [1, 8, 8], strides = [1, 1, 1]} : vector<1x8x128xf32> to vector<1x8x8xf32>
    %20 = arith.truncf %19 : vector<1x8x8xf32> to vector<1x8x8xbf16>
    %21 = vector.extract_strided_slice %18 {offsets = [0, 0, 32], sizes = [1, 8, 8], strides = [1, 1, 1]} : vector<1x8x128xf32> to vector<1x8x8xf32>
    %22 = arith.truncf %21 : vector<1x8x8xf32> to vector<1x8x8xbf16>
    %23 = vector.extract_strided_slice %18 {offsets = [0, 0, 64], sizes = [1, 8, 8], strides = [1, 1, 1]} : vector<1x8x128xf32> to vector<1x8x8xf32>
    %24 = arith.truncf %23 : vector<1x8x8xf32> to vector<1x8x8xbf16>
    "tpu.trace_start"() <{level = 10 : i32, message = "bqd,bkd->bqk"}> : () -> ()
    %cst_7 = arith.constant dense<0.000000e+00> : vector<1x8x8xf32>
    %25 = tpu.matmul %20, %22, %cst_7 {dimension_numbers = #tpu.dot_dimension_numbers<[2], [2], [1], [1], [0, 0, 0, 1, 1, 1], [0], [0]>} : vector<1x8x8xbf16>, vector<1x8x8xbf16>, vector<1x8x8xf32> -> vector<1x8x8xf32>
    "tpu.trace_stop"() : () -> ()
    %cst_8 = arith.constant dense<0xFF800000> : vector<1x8xf32>
    %26 = vector.multi_reduction <maximumf>, %25, %cst_8 [2] : vector<1x8x8xf32> to vector<1x8xf32>
    %27 = vector.shape_cast %26 : vector<1x8xf32> to vector<1x8x1xf32>
    %28 = vector.broadcast %27 : vector<1x8x1xf32> to vector<1x8x8xf32>
    %29 = arith.subf %25, %28 : vector<1x8x8xf32>
    %30 = math.exp %29 : vector<1x8x8xf32>
    %cst_9 = arith.constant dense<0.000000e+00> : vector<1x8xf32>
    %31 = vector.multi_reduction <add>, %30, %cst_9 [2] : vector<1x8x8xf32> to vector<1x8xf32>
    %32 = vector.shape_cast %31 : vector<1x8xf32> to vector<1x8x1xf32>
    %33 = tpu.reciprocal %32 {approx = true} : vector<1x8x1xf32> -> vector<1x8x1xf32>
    %34 = vector.broadcast %33 : vector<1x8x1xf32> to vector<1x8x8xf32>
    %35 = arith.mulf %30, %34 : vector<1x8x8xf32>
    %36 = arith.truncf %35 : vector<1x8x8xf32> to vector<1x8x8xbf16>
    "tpu.trace_start"() <{level = 10 : i32, message = "bqk,bkd->bqd"}> : () -> ()
    %cst_10 = arith.constant dense<0.000000e+00> : vector<1x8x8xf32>
    %37 = tpu.matmul %36, %24, %cst_10 {dimension_numbers = #tpu.dot_dimension_numbers<[2], [1], [1], [2], [0, 0, 0, 1, 1, 2], [0], [0]>} : vector<1x8x8xbf16>, vector<1x8x8xbf16>, vector<1x8x8xf32> -> vector<1x8x8xf32>
    "tpu.trace_stop"() : () -> ()
    %38 = vector.extract_strided_slice %18 {offsets = [0, 0, 8], sizes = [1, 8, 8], strides = [1, 1, 1]} : vector<1x8x128xf32> to vector<1x8x8xf32>
    %39 = arith.truncf %38 : vector<1x8x8xf32> to vector<1x8x8xbf16>
    %40 = vector.extract_strided_slice %18 {offsets = [0, 0, 40], sizes = [1, 8, 8], strides = [1, 1, 1]} : vector<1x8x128xf32> to vector<1x8x8xf32>
    %41 = arith.truncf %40 : vector<1x8x8xf32> to vector<1x8x8xbf16>
    %42 = vector.extract_strided_slice %18 {offsets = [0, 0, 72], sizes = [1, 8, 8], strides = [1, 1, 1]} : vector<1x8x128xf32> to vector<1x8x8xf32>
    %43 = arith.truncf %42 : vector<1x8x8xf32> to vector<1x8x8xbf16>
    "tpu.trace_start"() <{level = 10 : i32, message = "bqd,bkd->bqk"}> : () -> ()
    %cst_11 = arith.constant dense<0.000000e+00> : vector<1x8x8xf32>
    %44 = tpu.matmul %39, %41, %cst_11 {dimension_numbers = #tpu.dot_dimension_numbers<[2], [2], [1], [1], [0, 0, 0, 1, 1, 1], [0], [0]>} : vector<1x8x8xbf16>, vector<1x8x8xbf16>, vector<1x8x8xf32> -> vector<1x8x8xf32>
    "tpu.trace_stop"() : () -> ()
    %cst_12 = arith.constant dense<0xFF800000> : vector<1x8xf32>
    %45 = vector.multi_reduction <maximumf>, %44, %cst_12 [2] : vector<1x8x8xf32> to vector<1x8xf32>
    %46 = vector.shape_cast %45 : vector<1x8xf32> to vector<1x8x1xf32>
    %47 = vector.broadcast %46 : vector<1x8x1xf32> to vector<1x8x8xf32>
    %48 = arith.subf %44, %47 : vector<1x8x8xf32>
    %49 = math.exp %48 : vector<1x8x8xf32>
    %cst_13 = arith.constant dense<0.000000e+00> : vector<1x8xf32>
    %50 = vector.multi_reduction <add>, %49, %cst_13 [2] : vector<1x8x8xf32> to vector<1x8xf32>
    %51 = vector.shape_cast %50 : vector<1x8xf32> to vector<1x8x1xf32>
    %52 = tpu.reciprocal %51 {approx = true} : vector<1x8x1xf32> -> vector<1x8x1xf32>
    %53 = vector.broadcast %52 : vector<1x8x1xf32> to vector<1x8x8xf32>
    %54 = arith.mulf %49, %53 : vector<1x8x8xf32>
    %55 = arith.truncf %54 : vector<1x8x8xf32> to vector<1x8x8xbf16>
    "tpu.trace_start"() <{level = 10 : i32, message = "bqk,bkd->bqd"}> : () -> ()
    %cst_14 = arith.constant dense<0.000000e+00> : vector<1x8x8xf32>
    %56 = tpu.matmul %55, %43, %cst_14 {dimension_numbers = #tpu.dot_dimension_numbers<[2], [1], [1], [2], [0, 0, 0, 1, 1, 2], [0], [0]>} : vector<1x8x8xbf16>, vector<1x8x8xbf16>, vector<1x8x8xf32> -> vector<1x8x8xf32>
    "tpu.trace_stop"() : () -> ()
    %57 = vector.extract_strided_slice %18 {offsets = [0, 0, 16], sizes = [1, 8, 8], strides = [1, 1, 1]} : vector<1x8x128xf32> to vector<1x8x8xf32>
    %58 = arith.truncf %57 : vector<1x8x8xf32> to vector<1x8x8xbf16>
    %59 = vector.extract_strided_slice %18 {offsets = [0, 0, 48], sizes = [1, 8, 8], strides = [1, 1, 1]} : vector<1x8x128xf32> to vector<1x8x8xf32>
    %60 = arith.truncf %59 : vector<1x8x8xf32> to vector<1x8x8xbf16>
    %61 = vector.extract_strided_slice %18 {offsets = [0, 0, 80], sizes = [1, 8, 8], strides = [1, 1, 1]} : vector<1x8x128xf32> to vector<1x8x8xf32>
    %62 = arith.truncf %61 : vector<1x8x8xf32> to vector<1x8x8xbf16>
    "tpu.trace_start"() <{level = 10 : i32, message = "bqd,bkd->bqk"}> : () -> ()
    %cst_15 = arith.constant dense<0.000000e+00> : vector<1x8x8xf32>
    %63 = tpu.matmul %58, %60, %cst_15 {dimension_numbers = #tpu.dot_dimension_numbers<[2], [2], [1], [1], [0, 0, 0, 1, 1, 1], [0], [0]>} : vector<1x8x8xbf16>, vector<1x8x8xbf16>, vector<1x8x8xf32> -> vector<1x8x8xf32>
    "tpu.trace_stop"() : () -> ()
    %cst_16 = arith.constant dense<0xFF800000> : vector<1x8xf32>
    %64 = vector.multi_reduction <maximumf>, %63, %cst_16 [2] : vector<1x8x8xf32> to vector<1x8xf32>
    %65 = vector.shape_cast %64 : vector<1x8xf32> to vector<1x8x1xf32>
    %66 = vector.broadcast %65 : vector<1x8x1xf32> to vector<1x8x8xf32>
    %67 = arith.subf %63, %66 : vector<1x8x8xf32>
    %68 = math.exp %67 : vector<1x8x8xf32>
    %cst_17 = arith.constant dense<0.000000e+00> : vector<1x8xf32>
    %69 = vector.multi_reduction <add>, %68, %cst_17 [2] : vector<1x8x8xf32> to vector<1x8xf32>
    %70 = vector.shape_cast %69 : vector<1x8xf32> to vector<1x8x1xf32>
    %71 = tpu.reciprocal %70 {approx = true} : vector<1x8x1xf32> -> vector<1x8x1xf32>
    %72 = vector.broadcast %71 : vector<1x8x1xf32> to vector<1x8x8xf32>
    %73 = arith.mulf %68, %72 : vector<1x8x8xf32>
    %74 = arith.truncf %73 : vector<1x8x8xf32> to vector<1x8x8xbf16>
    "tpu.trace_start"() <{level = 10 : i32, message = "bqk,bkd->bqd"}> : () -> ()
    %cst_18 = arith.constant dense<0.000000e+00> : vector<1x8x8xf32>
    %75 = tpu.matmul %74, %62, %cst_18 {dimension_numbers = #tpu.dot_dimension_numbers<[2], [1], [1], [2], [0, 0, 0, 1, 1, 2], [0], [0]>} : vector<1x8x8xbf16>, vector<1x8x8xbf16>, vector<1x8x8xf32> -> vector<1x8x8xf32>
    "tpu.trace_stop"() : () -> ()
    %76 = vector.extract_strided_slice %18 {offsets = [0, 0, 24], sizes = [1, 8, 8], strides = [1, 1, 1]} : vector<1x8x128xf32> to vector<1x8x8xf32>
    %77 = arith.truncf %76 : vector<1x8x8xf32> to vector<1x8x8xbf16>
    %78 = vector.extract_strided_slice %18 {offsets = [0, 0, 56], sizes = [1, 8, 8], strides = [1, 1, 1]} : vector<1x8x128xf32> to vector<1x8x8xf32>
    %79 = arith.truncf %78 : vector<1x8x8xf32> to vector<1x8x8xbf16>
    %80 = vector.extract_strided_slice %18 {offsets = [0, 0, 88], sizes = [1, 8, 8], strides = [1, 1, 1]} : vector<1x8x128xf32> to vector<1x8x8xf32>
    %81 = arith.truncf %80 : vector<1x8x8xf32> to vector<1x8x8xbf16>
    "tpu.trace_start"() <{level = 10 : i32, message = "bqd,bkd->bqk"}> : () -> ()
    %cst_19 = arith.constant dense<0.000000e+00> : vector<1x8x8xf32>
    %82 = tpu.matmul %77, %79, %cst_19 {dimension_numbers = #tpu.dot_dimension_numbers<[2], [2], [1], [1], [0, 0, 0, 1, 1, 1], [0], [0]>} : vector<1x8x8xbf16>, vector<1x8x8xbf16>, vector<1x8x8xf32> -> vector<1x8x8xf32>
    "tpu.trace_stop"() : () -> ()
    %cst_20 = arith.constant dense<0xFF800000> : vector<1x8xf32>
    %83 = vector.multi_reduction <maximumf>, %82, %cst_20 [2] : vector<1x8x8xf32> to vector<1x8xf32>
    %84 = vector.shape_cast %83 : vector<1x8xf32> to vector<1x8x1xf32>
    %85 = vector.broadcast %84 : vector<1x8x1xf32> to vector<1x8x8xf32>
    %86 = arith.subf %82, %85 : vector<1x8x8xf32>
    %87 = math.exp %86 : vector<1x8x8xf32>
    %cst_21 = arith.constant dense<0.000000e+00> : vector<1x8xf32>
    %88 = vector.multi_reduction <add>, %87, %cst_21 [2] : vector<1x8x8xf32> to vector<1x8xf32>
    %89 = vector.shape_cast %88 : vector<1x8xf32> to vector<1x8x1xf32>
    %90 = tpu.reciprocal %89 {approx = true} : vector<1x8x1xf32> -> vector<1x8x1xf32>
    %91 = vector.broadcast %90 : vector<1x8x1xf32> to vector<1x8x8xf32>
    %92 = arith.mulf %87, %91 : vector<1x8x8xf32>
    %93 = arith.truncf %92 : vector<1x8x8xf32> to vector<1x8x8xbf16>
    "tpu.trace_start"() <{level = 10 : i32, message = "bqk,bkd->bqd"}> : () -> ()
    %cst_22 = arith.constant dense<0.000000e+00> : vector<1x8x8xf32>
    %94 = tpu.matmul %93, %81, %cst_22 {dimension_numbers = #tpu.dot_dimension_numbers<[2], [1], [1], [2], [0, 0, 0, 1, 1, 2], [0], [0]>} : vector<1x8x8xbf16>, vector<1x8x8xbf16>, vector<1x8x8xf32> -> vector<1x8x8xf32>
    %cst_23 = arith.constant 0.000000e+00 : f32
    "tpu.trace_stop"() : () -> ()
    %95 = vector.broadcast %cst_23 : f32 to vector<1x8x96xf32>
    %96 = tpu.concatenate %37, %56, %75, %94, %95 in 2 : vector<1x8x8xf32>, vector<1x8x8xf32>, vector<1x8x8xf32>, vector<1x8x8xf32>, vector<1x8x96xf32> -> vector<1x8x128xf32>
    %97 = vector.shape_cast %96 : vector<1x8x128xf32> to vector<8x128xf32>
    %98 = arith.truncf %97 : vector<8x128xf32> to vector<8x128xbf16>
    %99 = arith.index_cast %arg1 : i32 to index
    %c0_24 = arith.constant 0 : index
    %c0_25 = arith.constant 0 : index
    %100 = vector.load %arg5[%99, %c0_24, %c0_25] : memref<2x128x128xbf16, #tpu.memory_space<vmem>>, vector<1x128x128xbf16>
    %101 = vector.shape_cast %100 : vector<1x128x128xbf16> to vector<128x128xbf16>
    %cst_26 = arith.constant dense<0.000000e+00> : vector<8x128xf32>
    %102 = tpu.matmul %98, %101, %cst_26 {dimension_numbers = #tpu.dot_dimension_numbers<[1], [0], [0], [1], [0, 0, 1, 1], [], []>} : vector<8x128xbf16>, vector<128x128xbf16>, vector<8x128xf32> -> vector<8x128xf32>
    %103 = arith.index_cast %arg1 : i32 to index
    %c0_27 = arith.constant 0 : index
    %c0_28 = arith.constant 0 : index
    %104 = vector.load %arg6[%103, %c0_27, %c0_28] : memref<2x1x128xf32, #tpu.memory_space<vmem>>, vector<1x1x128xf32>
    %105 = vector.shape_cast %104 : vector<1x1x128xf32> to vector<1x128xf32>
    %106 = vector.broadcast %105 : vector<1x128xf32> to vector<8x128xf32>
    %107 = arith.addf %102, %106 : vector<8x128xf32>
    %108 = arith.addf %4, %107 : vector<8x128xf32>
    %109 = arith.index_cast %arg1 : i32 to index
    %c0_29 = arith.constant 0 : index
    %c0_30 = arith.constant 0 : index
    %110 = vector.load %arg11[%109, %c0_29, %c0_30] : memref<2x1x128xf32, #tpu.memory_space<vmem>>, vector<1x1x128xf32>
    %111 = vector.shape_cast %110 : vector<1x1x128xf32> to vector<1x128xf32>
    %112 = arith.index_cast %arg1 : i32 to index
    %c0_31 = arith.constant 0 : index
    %c0_32 = arith.constant 0 : index
    %113 = vector.load %arg12[%112, %c0_31, %c0_32] : memref<2x1x128xf32, #tpu.memory_space<vmem>>, vector<1x1x128xf32>
    %114 = vector.shape_cast %113 : vector<1x1x128xf32> to vector<1x128xf32>
    %cst_33 = arith.constant 0.000000e+00 : f32
    %115 = vector.shape_cast %7 : vector<1x128xi1> to vector<1x128xi1>
    %116 = vector.broadcast %115 : vector<1x128xi1> to vector<8x128xi1>
    %117 = vector.broadcast %cst_33 : f32 to vector<8x128xf32>
    %118 = arith.select %116, %108, %117 : vector<8x128xi1>, vector<8x128xf32>
    %cst_34 = arith.constant dense<0.000000e+00> : vector<8xf32>
    %119 = vector.multi_reduction <add>, %118, %cst_34 [1] : vector<8x128xf32> to vector<8xf32>
    %120 = vector.shape_cast %119 : vector<8xf32> to vector<8x1xf32>
    %cst_35 = arith.constant 3.125000e-02 : f32
    %121 = vector.broadcast %cst_35 : f32 to vector<8x1xf32>
    %122 = arith.mulf %120, %121 : vector<8x1xf32>
    %123 = vector.broadcast %122 : vector<8x1xf32> to vector<8x128xf32>
    %124 = arith.subf %108, %123 : vector<8x128xf32>
    %cst_36 = arith.constant 0.000000e+00 : f32
    %125 = vector.shape_cast %7 : vector<1x128xi1> to vector<1x128xi1>
    %126 = vector.broadcast %125 : vector<1x128xi1> to vector<8x128xi1>
    %127 = vector.broadcast %cst_36 : f32 to vector<8x128xf32>
    %128 = arith.select %126, %124, %127 : vector<8x128xi1>, vector<8x128xf32>
    %129 = arith.mulf %128, %128 : vector<8x128xf32>
    %cst_37 = arith.constant dense<0.000000e+00> : vector<8xf32>
    %130 = vector.multi_reduction <add>, %129, %cst_37 [1] : vector<8x128xf32> to vector<8xf32>
    %131 = vector.shape_cast %130 : vector<8xf32> to vector<8x1xf32>
    %cst_38 = arith.constant 3.125000e-02 : f32
    %132 = vector.broadcast %cst_38 : f32 to vector<8x1xf32>
    %133 = arith.mulf %131, %132 : vector<8x1xf32>
    %cst_39 = arith.constant 9.99999974E-6 : f32
    %134 = vector.broadcast %cst_39 : f32 to vector<8x1xf32>
    %135 = arith.addf %133, %134 : vector<8x1xf32>
    %136 = math.rsqrt %135 : vector<8x1xf32>
    %137 = vector.broadcast %136 : vector<8x1xf32> to vector<8x128xf32>
    %138 = arith.mulf %128, %137 : vector<8x128xf32>
    %139 = vector.broadcast %111 : vector<1x128xf32> to vector<8x128xf32>
    %140 = arith.mulf %138, %139 : vector<8x128xf32>
    %141 = vector.broadcast %114 : vector<1x128xf32> to vector<8x128xf32>
    %142 = arith.addf %140, %141 : vector<8x128xf32>
    %143 = arith.truncf %142 : vector<8x128xf32> to vector<8x128xbf16>
    %144 = arith.index_cast %arg1 : i32 to index
    %c0_40 = arith.constant 0 : index
    %c0_41 = arith.constant 0 : index
    %145 = vector.load %arg7[%144, %c0_40, %c0_41] : memref<2x128x128xbf16, #tpu.memory_space<vmem>>, vector<1x128x128xbf16>
    %146 = vector.shape_cast %145 : vector<1x128x128xbf16> to vector<128x128xbf16>
    %cst_42 = arith.constant dense<0.000000e+00> : vector<8x128xf32>
    %147 = tpu.matmul %143, %146, %cst_42 {dimension_numbers = #tpu.dot_dimension_numbers<[1], [0], [0], [1], [0, 0, 1, 1], [], []>} : vector<8x128xbf16>, vector<128x128xbf16>, vector<8x128xf32> -> vector<8x128xf32>
    %148 = arith.index_cast %arg1 : i32 to index
    %c0_43 = arith.constant 0 : index
    %c0_44 = arith.constant 0 : index
    %149 = vector.load %arg8[%148, %c0_43, %c0_44] : memref<2x1x128xf32, #tpu.memory_space<vmem>>, vector<1x1x128xf32>
    %150 = vector.shape_cast %149 : vector<1x1x128xf32> to vector<1x128xf32>
    %151 = vector.broadcast %150 : vector<1x128xf32> to vector<8x128xf32>
    %152 = arith.addf %147, %151 : vector<8x128xf32>
    %cst_45 = arith.constant 0.000000e+00 : f32
    %153 = vector.broadcast %cst_45 : f32 to vector<8x128xf32>
    %154 = arith.maximumf %152, %153 : vector<8x128xf32>
    %155 = arith.truncf %154 : vector<8x128xf32> to vector<8x128xbf16>
    %156 = arith.index_cast %arg1 : i32 to index
    %c0_46 = arith.constant 0 : index
    %c0_47 = arith.constant 0 : index
    %157 = vector.load %arg9[%156, %c0_46, %c0_47] : memref<2x128x128xbf16, #tpu.memory_space<vmem>>, vector<1x128x128xbf16>
    %158 = vector.shape_cast %157 : vector<1x128x128xbf16> to vector<128x128xbf16>
    %cst_48 = arith.constant dense<0.000000e+00> : vector<8x128xf32>
    %159 = tpu.matmul %155, %158, %cst_48 {dimension_numbers = #tpu.dot_dimension_numbers<[1], [0], [0], [1], [0, 0, 1, 1], [], []>} : vector<8x128xbf16>, vector<128x128xbf16>, vector<8x128xf32> -> vector<8x128xf32>
    %160 = arith.index_cast %arg1 : i32 to index
    %c0_49 = arith.constant 0 : index
    %c0_50 = arith.constant 0 : index
    %161 = vector.load %arg10[%160, %c0_49, %c0_50] : memref<2x1x128xf32, #tpu.memory_space<vmem>>, vector<1x1x128xf32>
    %162 = vector.shape_cast %161 : vector<1x1x128xf32> to vector<1x128xf32>
    %163 = vector.broadcast %162 : vector<1x128xf32> to vector<8x128xf32>
    %164 = arith.addf %159, %163 : vector<8x128xf32>
    %165 = arith.addf %142, %164 : vector<8x128xf32>
    %166 = arith.index_cast %arg1 : i32 to index
    %c0_51 = arith.constant 0 : index
    %c0_52 = arith.constant 0 : index
    %167 = vector.load %arg13[%166, %c0_51, %c0_52] : memref<2x1x128xf32, #tpu.memory_space<vmem>>, vector<1x1x128xf32>
    %168 = vector.shape_cast %167 : vector<1x1x128xf32> to vector<1x128xf32>
    %169 = arith.index_cast %arg1 : i32 to index
    %c0_53 = arith.constant 0 : index
    %c0_54 = arith.constant 0 : index
    %170 = vector.load %arg14[%169, %c0_53, %c0_54] : memref<2x1x128xf32, #tpu.memory_space<vmem>>, vector<1x1x128xf32>
    %171 = vector.shape_cast %170 : vector<1x1x128xf32> to vector<1x128xf32>
    %cst_55 = arith.constant 0.000000e+00 : f32
    %172 = vector.shape_cast %7 : vector<1x128xi1> to vector<1x128xi1>
    %173 = vector.broadcast %172 : vector<1x128xi1> to vector<8x128xi1>
    %174 = vector.broadcast %cst_55 : f32 to vector<8x128xf32>
    %175 = arith.select %173, %165, %174 : vector<8x128xi1>, vector<8x128xf32>
    %cst_56 = arith.constant dense<0.000000e+00> : vector<8xf32>
    %176 = vector.multi_reduction <add>, %175, %cst_56 [1] : vector<8x128xf32> to vector<8xf32>
    %177 = vector.shape_cast %176 : vector<8xf32> to vector<8x1xf32>
    %cst_57 = arith.constant 3.125000e-02 : f32
    %178 = vector.broadcast %cst_57 : f32 to vector<8x1xf32>
    %179 = arith.mulf %177, %178 : vector<8x1xf32>
    %180 = vector.broadcast %179 : vector<8x1xf32> to vector<8x128xf32>
    %181 = arith.subf %165, %180 : vector<8x128xf32>
    %cst_58 = arith.constant 0.000000e+00 : f32
    %182 = vector.shape_cast %7 : vector<1x128xi1> to vector<1x128xi1>
    %183 = vector.broadcast %182 : vector<1x128xi1> to vector<8x128xi1>
    %184 = vector.broadcast %cst_58 : f32 to vector<8x128xf32>
    %185 = arith.select %183, %181, %184 : vector<8x128xi1>, vector<8x128xf32>
    %186 = arith.mulf %185, %185 : vector<8x128xf32>
    %cst_59 = arith.constant dense<0.000000e+00> : vector<8xf32>
    %187 = vector.multi_reduction <add>, %186, %cst_59 [1] : vector<8x128xf32> to vector<8xf32>
    %188 = vector.shape_cast %187 : vector<8xf32> to vector<8x1xf32>
    %cst_60 = arith.constant 3.125000e-02 : f32
    %189 = vector.broadcast %cst_60 : f32 to vector<8x1xf32>
    %190 = arith.mulf %188, %189 : vector<8x1xf32>
    %cst_61 = arith.constant 9.99999974E-6 : f32
    %191 = vector.broadcast %cst_61 : f32 to vector<8x1xf32>
    %192 = arith.addf %190, %191 : vector<8x1xf32>
    %193 = math.rsqrt %192 : vector<8x1xf32>
    %194 = vector.broadcast %193 : vector<8x1xf32> to vector<8x128xf32>
    %195 = arith.mulf %185, %194 : vector<8x128xf32>
    %196 = vector.broadcast %168 : vector<1x128xf32> to vector<8x128xf32>
    %197 = arith.mulf %195, %196 : vector<8x128xf32>
    %198 = vector.broadcast %171 : vector<1x128xf32> to vector<8x128xf32>
    %199 = arith.addf %197, %198 : vector<8x128xf32>
    %200 = vector.shape_cast %199 : vector<8x128xf32> to vector<1x8x128xf32>
    %c0_62 = arith.constant 0 : index
    %c0_63 = arith.constant 0 : index
    %c0_64 = arith.constant 0 : index
    %201 = vector.load %arg15[%c0_62, %c0_63, %c0_64] : memref<1x8x128xf32, #tpu.memory_space<vmem>>, vector<1x8x128xf32>
    tpu.vector_store %arg15[%c0_62, %c0_63, %c0_64], %200 {strides = array<i32>} : memref<1x8x128xf32, #tpu.memory_space<vmem>>, vector<1x8x128xf32>,
    return
  }
  func.func @transform_0(%arg0: i32, %arg1: i32) -> (i32, i32, i32) {
    %c0_i32 = arith.constant 0 : i32
    %c0_i32_0 = arith.constant 0 : i32
    %c0_i32_1 = arith.constant 0 : i32
    return %arg0, %c0_i32, %c0_i32_0 : i32, i32, i32
  }
  func.func @transform_1(%arg0: i32, %arg1: i32) -> (i32, i32, i32) {
    %c0_i32 = arith.constant 0 : i32
    %c0_i32_0 = arith.constant 0 : i32
    %c0_i32_1 = arith.constant 0 : i32
    %c0_i32_2 = arith.constant 0 : i32
    return %c0_i32, %c0_i32_0, %c0_i32_1 : i32, i32, i32
  }
  func.func @transform_2(%arg0: i32, %arg1: i32) -> (i32, i32, i32) {
    %c0_i32 = arith.constant 0 : i32
    %c0_i32_0 = arith.constant 0 : i32
    %c0_i32_1 = arith.constant 0 : i32
    %c0_i32_2 = arith.constant 0 : i32
    return %c0_i32, %c0_i32_0, %c0_i32_1 : i32, i32, i32
  }
  func.func @transform_3(%arg0: i32, %arg1: i32) -> (i32, i32, i32) {
    %c0_i32 = arith.constant 0 : i32
    %c0_i32_0 = arith.constant 0 : i32
    %c0_i32_1 = arith.constant 0 : i32
    %c0_i32_2 = arith.constant 0 : i32
    return %c0_i32, %c0_i32_0, %c0_i32_1 : i32, i32, i32
  }
  func.func @transform_4(%arg0: i32, %arg1: i32) -> (i32, i32, i32) {
    %c0_i32 = arith.constant 0 : i32
    %c0_i32_0 = arith.constant 0 : i32
    %c0_i32_1 = arith.constant 0 : i32
    %c0_i32_2 = arith.constant 0 : i32
    return %c0_i32, %c0_i32_0, %c0_i32_1 : i32, i32, i32
  }
  func.func @transform_5(%arg0: i32, %arg1: i32) -> (i32, i32, i32) {
    %c0_i32 = arith.constant 0 : i32
    %c0_i32_0 = arith.constant 0 : i32
    %c0_i32_1 = arith.constant 0 : i32
    %c0_i32_2 = arith.constant 0 : i32
    return %c0_i32, %c0_i32_0, %c0_i32_1 : i32, i32, i32
  }
  func.func @transform_6(%arg0: i32, %arg1: i32) -> (i32, i32, i32) {
    %c0_i32 = arith.constant 0 : i32
    %c0_i32_0 = arith.constant 0 : i32
    %c0_i32_1 = arith.constant 0 : i32
    %c0_i32_2 = arith.constant 0 : i32
    return %c0_i32, %c0_i32_0, %c0_i32_1 : i32, i32, i32
  }
  func.func @transform_7(%arg0: i32, %arg1: i32) -> (i32, i32, i32) {
    %c0_i32 = arith.constant 0 : i32
    %c0_i32_0 = arith.constant 0 : i32
    %c0_i32_1 = arith.constant 0 : i32
    %c0_i32_2 = arith.constant 0 : i32
    return %c0_i32, %c0_i32_0, %c0_i32_1 : i32, i32, i32
  }
  func.func @transform_8(%arg0: i32, %arg1: i32) -> (i32, i32, i32) {
    %c0_i32 = arith.constant 0 : i32
    %c0_i32_0 = arith.constant 0 : i32
    %c0_i32_1 = arith.constant 0 : i32
    %c0_i32_2 = arith.constant 0 : i32
    return %c0_i32, %c0_i32_0, %c0_i32_1 : i32, i32, i32
  }
  func.func @transform_9(%arg0: i32, %arg1: i32) -> (i32, i32, i32) {
    %c0_i32 = arith.constant 0 : i32
    %c0_i32_0 = arith.constant 0 : i32
    %c0_i32_1 = arith.constant 0 : i32
    %c0_i32_2 = arith.constant 0 : i32
    return %c0_i32, %c0_i32_0, %c0_i32_1 : i32, i32, i32
  }
  func.func @transform_10(%arg0: i32, %arg1: i32) -> (i32, i32, i32) {
    %c0_i32 = arith.constant 0 : i32
    %c0_i32_0 = arith.constant 0 : i32
    %c0_i32_1 = arith.constant 0 : i32
    %c0_i32_2 = arith.constant 0 : i32
    return %c0_i32, %c0_i32_0, %c0_i32_1 : i32, i32, i32
  }
  func.func @transform_11(%arg0: i32, %arg1: i32) -> (i32, i32, i32) {
    %c0_i32 = arith.constant 0 : i32
    %c0_i32_0 = arith.constant 0 : i32
    %c0_i32_1 = arith.constant 0 : i32
    %c0_i32_2 = arith.constant 0 : i32
    return %c0_i32, %c0_i32_0, %c0_i32_1 : i32, i32, i32
  }
  func.func @transform_12(%arg0: i32, %arg1: i32) -> (i32, i32, i32) {
    %c0_i32 = arith.constant 0 : i32
    %c0_i32_0 = arith.constant 0 : i32
    %c0_i32_1 = arith.constant 0 : i32
    %c0_i32_2 = arith.constant 0 : i32
    return %c0_i32, %c0_i32_0, %c0_i32_1 : i32, i32, i32
  }
  func.func @transform_13(%arg0: i32, %arg1: i32) -> (i32, i32, i32) {
    %c0_i32 = arith.constant 0 : i32
    %c0_i32_0 = arith.constant 0 : i32
    %c0_i32_1 = arith.constant 0 : i32
    return %arg0, %c0_i32, %c0_i32_0 : i32, i32, i32
  }
}

</mosaic_0001>

<bundles_post_ra>
// kernel: tpu_custom_call.1
= control target key start
LH: loop header
LB: loop body
LE: loop exit
PB: predicated region body
PF: predicated region fallthrough
CT: control target
= control target key end

     0   :  { %s2863_s0 = inlined_call_operand.hbm [shape: f32[2,8,128], index: 0, kind: input, shape index: {}]   ;;  %s2864_s1 = inlined_call_operand.hbm [shape: bf16[2,128,128], index: 1, kind: input, shape index: {}]   ;;  %s2865_s2 = inlined_call_operand.vmem [shape: f32[2,1,128], index: 2, kind: input, shape index: {}]   ;;  %s2866_s3 = inlined_call_operand.hbm [shape: bf16[2,128,128], index: 3, kind: input, shape index: {}]   ;;  %s2867_s4 = inlined_call_operand.vmem [shape: f32[2,1,128], index: 4, kind: input, shape index: {}]   ;;  %s2868_s5 = inlined_call_operand.hbm [shape: bf16[2,128,128], index: 5, kind: input, shape index: {}]   ;;  %s2869_s6 = inlined_call_operand.vmem [shape: f32[2,1,128], index: 6, kind: input, shape index: {}]   ;;  %s2870_s7 = inlined_call_operand.hbm [shape: bf16[2,128,128], index: 7, kind: input, shape index: {}]   ;;  %s2871_s8 = inlined_call_operand.vmem [shape: f32[2,1,128], index: 8, kind: input, shape index: {}]   ;;  %s2872_s9 = inlined_call_operand.vmem [shape: f32[2,1,128], index: 9, kind: input, shape index: {}]   ;;  %s2873_s10 = inlined_call_operand.vmem [shape: f32[2,1,128], index: 10, kind: input, shape index: {}]   ;;  %s2874_s11 = inlined_call_operand.vmem [shape: f32[2,1,128], index: 11, kind: input, shape index: {}]   ;;  %s2875_s12 = inlined_call_operand.vmem [shape: f32[2,1,128], index: 12, kind: input, shape index: {}]   ;;  %s2876_s13 = inlined_call_operand.hbm [shape: f32[2,8,128], index: 13, kind: output, shape index: {}]  }
   0x1   :  { %2883 = sst [smem:[#allocation22_spill]] %s2864_s1 }
   0x2   :  { %2884 = sst [smem:[#allocation23_spill]] %s2866_s3 }
   0x3   :  { %2885 = sst [smem:[#allocation24_spill]] %s2868_s5 }
   0x4   :  { %2886 = sst [smem:[#allocation25_spill]] %s2870_s7 }
   0x5   :  { %2887 = sst [smem:[#allocation26_spill]] %s2874_s11 }
   0x6   :  { %2888 = sst [smem:[#allocation27_spill]] %s2875_s12 }
   0x7   :  { %2889 = sst [smem:[#allocation28_spill]] %s2876_s13 }
   0x8   :  { %18 = vsyncpa [#allocation3], 0 }
   0x9   :  { %20 = vsyncpa [#allocation3 + $0x1], 0 }
   0xa   :  { %21 = vsyncpa [#allocation6], 0 }
   0xb   :  { %22 = vsyncpa [#allocation9], 0 }
   0xc   :  { %23 = vsyncpa [#allocation4], 0 }
   0xd   :  { %25 = vsyncpa [#allocation4 + $0x1], 0  ;;  %s2459_s25 = smov 0   ;;  %s2461_s26 = smov 0  }
   0xe   :  { %s2463_s27 = smov 0   ;;  %s2465_s28 = smov 0  }
   0xf   :  { %s2467_s29 = smov 0   ;;  %s2469_s30 = smov 0  }
  0x10   :  { %s2471_s14 = smov 0   ;;  %s2473_s15 = smov 0  }
  0x11 LB: > { %2890 = sst [smem:[#allocation16_spill]] %s2335_s25  ;;  %s2877_s16 = sadd.s32 4294967295, %s2363_s15   ;;  %s2363_s15 = sphi %s2473_s15, %s31_s15   ;;  %s2359_s14 = sphi %s2471_s14, %s2918_s14   ;;  %s2355_s30 = sphi %s2469_s30, %s2917_s30   ;;  %s2351_s29 = sphi %s2467_s29, %s2916_s29   ;;  %s2347_s28 = sphi %s2465_s28, %s2915_s28   ;;  %s2343_s27 = sphi %s2463_s27, %s2921_s27   ;;  %s2339_s26 = sphi %s2461_s26, %s2920_s26   ;;  %s2335_s25 = sphi %s2459_s25, %s2919_s25  }
  0x12   : > { %2891 = sst [smem:[#allocation17_spill]] %s2351_s29  ;;  %p1678_p0 = scmp.ge.s32.totalorder %s2363_s15, 1 }
  0x13   : > { %2892 = sst [smem:[#allocation18_spill]] %s2355_s30  ;;  %p2503_p1 = scmp.eq.s32.totalorder %s2877_s16, 0 }
  0x14   : > { %2893 = sst [smem:[#allocation19_spill]] %s2359_s14  ;;  %p352_p2 = scmp.lt.s32.totalorder %s2363_s15, 5 }
  0x15   : > { %s2365_s19 = smov [#allocation5]   ;;  %s2366_s22 = smov [#allocation8]  }
  0x16   : > { %p2508_p3 = pnand %p1678_p0, %p352_p2  ;;  %s364_s20 = sshll.u32 %s2365_s19, 4  ;;  %s365_s20 = int_to_ptr.vmem [resolvable:$true] %s364_s20 }
  0x17   : > { %s396_s23 = sshll.u32 %s2366_s22, 4  ;;  %s2367_s24 = smov [#allocation7]   ;;  %s397_s23 = int_to_ptr.vmem [resolvable:$true] %s396_s23 }
  0x18   : > { %p1958_p4 = pneg %p2508_p3  ;;  %s380_s16 = sshll.u32 %s2367_s24, 4  ;;  %s381_s16 = int_to_ptr.vmem [resolvable:$true] %s380_s16 }
  0x19   : > { %s2138_s13 = scalar_lea.vmem %s365_s20, 2048  ;;  %p2146_p10 = scmp.lt.s32.totalorder %s365_s20, %s365_s20 }
  0x1a   : > { %p2516_p5 = pnand %p1958_p4, %p2503_p1  ;;  %p2139_p7 = scmp.ne.s32.totalorder %s365_s20, %s2138_s13 }
  0x1b   : > { %p2147_p11 = scmp.lt.s32.totalorder %s2138_s13, %s2138_s13 }
  0x1c   : > { %p2129_p6 = pneg %p2516_p5 }
  0x1d   : > { %p2148_p12 = por %p2147_p11, %p2146_p10 }
  0x1e   : > { %p2141_p8 = pnand %p2139_p7, %p2129_p6 }
  0x20   : > { %p2142_p9 = pneg %p2141_p8 }
  0x22   : > { %p2149_p13 = pnand %p2148_p12, %p2142_p9 }
  0x24   : > { %2152 = shalt.err (!%p2149_p13)
}
  0x25   : > { %s2368_s19 = smov 64   ;;  %s2369_s22 = smov 4  }
  0x26   : > { %s2897_s1 = sld [smem:[#allocation22_spill]]  ;;  %s2164_s11 = scalar_lea.vmem %s397_s23, 2048 }
  0x27   : > { %p2165_p0 = scmp.ne.s32.totalorder %s397_s23, %s2164_s11  ;;  %p2172_p7 = scmp.lt.s32.totalorder %s397_s23, %s397_s23 }
  0x28   : > { %p2173_p8 = scmp.lt.s32.totalorder %s2164_s11, %s2164_s11 }
  0x29   : > { %p2167_p2 = pnand %p2165_p0, %p2129_p6 }
  0x2a   : > { %p2174_p9 = por %p2173_p8, %p2172_p7 }
  0x2b   : > { %p2168_p4 = pneg %p2167_p2 }
  0x2c   : > { %1961 = dma.hbm_to_vmem [thread:$0]  (!%p2516_p5), %s2897_s1, 2048, %s365_s20, [#allocation6], %s2368_s19, %s2368_s19, %s2369_s22  }
  0x2d   : > { %p2175_p10 = pnand %p2174_p9, %p2168_p4 }
  0x2f   : > { %2178 = shalt.err (!%p2175_p10)
}
  0x30   : > { %s2898_s5 = sld [smem:[#allocation24_spill]]  ;;  %s2190_s12 = scalar_lea.vmem %s381_s16, 2048 }
  0x31   : > { %p2191_p11 = scmp.ne.s32.totalorder %s381_s16, %s2190_s12  ;;  %p2198_p0 = scmp.lt.s32.totalorder %s381_s16, %s381_s16 }
  0x32   : > { %p2199_p2 = scmp.lt.s32.totalorder %s2190_s12, %s2190_s12 }
  0x33   : > { %p2193_p12 = pnand %p2191_p11, %p2129_p6 }
  0x34   : > { %p2200_p4 = por %p2199_p2, %p2198_p0 }
  0x35   : > { %p2194_p13 = pneg %p2193_p12 }
  0x36   : > { %1967 = dma.hbm_to_vmem [thread:$0]  (!%p2516_p5), %s2898_s5, 2048, %s397_s23, [#allocation9], %s2368_s19, %s2368_s19, %s2369_s22  }
  0x37   : > { %p2201_p7 = pnand %p2200_p4, %p2194_p13 }
  0x39   : > { %2204 = shalt.err (!%p2201_p7)
}
  0x3a   : > { %s2899_s3 = sld [smem:[#allocation23_spill]]  ;;  %s2370_s20 = smov [#allocation10]  }
  0x3b   : > { %s412_s23 = sshll.u32 %s2370_s20, 4  ;;  %s413_s23 = int_to_ptr.vmem [resolvable:$true] %s412_s23 }
  0x3c   : > { %s2216_s24 = scalar_lea.vmem %s413_s23, 2048  ;;  %p2224_p11 = scmp.lt.s32.totalorder %s413_s23, %s413_s23 }
  0x3d   : > { %p2217_p8 = scmp.ne.s32.totalorder %s413_s23, %s2216_s24  ;;  %p2225_p12 = scmp.lt.s32.totalorder %s2216_s24, %s2216_s24 }
  0x3f   : > { %p2219_p9 = pnand %p2217_p8, %p2129_p6  ;;  %p2226_p13 = por %p2225_p12, %p2224_p11 }
  0x40   : > { %1964 = dma.hbm_to_vmem [thread:$0]  (!%p2516_p5), %s2899_s3, 2048, %s381_s16, [#allocation6], %s2368_s19, %s2368_s19, %s2369_s22  }
  0x41   : > { %p2220_p10 = pneg %p2219_p9 }
  0x43   : > { %p2227_p0 = pnand %p2226_p13, %p2220_p10 }
  0x45   : > { %2230 = shalt.err (!%p2227_p0)
}
  0x46   : > { %s2900_s7 = sld [smem:[#allocation25_spill]]  ;;  %s1677_s21 = sadd.s32 4294967294, %s2363_s15  }
  0x47   : > { %s40_s12 = sadd.s32 1, %s2355_s30  ;;  %s43_s11 = sadd.s32 1, %s2359_s14 }
  0x48   : > { %p41_p6 = scmp.ge.s32.totalorder %s40_s12, 2  ;;  %s50_s29 = sadd.s32 1, %s2343_s27 }
  0x49   : > { %p57_p2 = scmp.ne.s32.totalorder %s2343_s27, %s2339_s26  ;;  %p58_p4 = scmp.eq.s32.totalorder %s2363_s15, 0 }
  0x4a   : > { %s2923_s12 = smov (%p41_p6, %s40_s12), 0  ;;  %s2925_s11 = smov (!%p41_p6, %s43_s11), %s2359_s14 }
  0x4b   : > { %2901 = sst [smem:[#allocation20_spill]] %s2923_s12  ;;  %p63_p7 = scmp.ne.s32.totalorder %s2339_s26, %s2335_s25 }
  0x4c   : > { %1970 = dma.hbm_to_vmem [thread:$0]  (!%p2516_p5), %s2900_s7, 2048, %s413_s23, [#allocation9], %s2368_s19, %s2368_s19, %s2369_s22  }
  0x4d   : > { %p45_p8 = scmp.ge.s32.totalorder %s2925_s11, 2  ;;  %s2902_s20 = sadd.s32 4294967295, %s2363_s15  }
  0x4e   : > { %p339_p9 = scmp.eq.s32.totalorder %s2902_s20, 3  ;;  %p2580_p5 = por %p58_p4, %p57_p2 }
  0x4f   : > { %p2586_p10 = por %p2503_p1, %p63_p7  ;;  %s2927_s11 = smov (%p45_p8, %s2925_s11), 0 }
  0x50   : > { %2905 = sst [smem:[#allocation21_spill]] %s2927_s11  ;;  %p2592_p11 = por %p339_p9, %p57_p2 }
  0x51   : > { %p345_p12 = scmp.eq.s32.totalorder %s1677_s21, 3  ;;  %s47_s24 = ssub.s32 %s2359_s14, %s2927_s11 }
  0x52   : > { %p1983_p13 = scmp.lt.s32.totalorder %s2363_s15, 4  ;;  %p48_p0 = scmp.eq.s32.totalorder %s47_s24, 0 }
  0x53   : > { %p2599_p6 = por %p345_p12, %p63_p7  ;;  %s441_s13 = sand.u32 1, %s2343_s27  }
  0x54   : > { %s1685_s20 = sshll.u32 %s2359_s14, 7  ;;  %s1684_s3 = sshll.u32 %s441_s13, 3 }
  0x55   : > { %s2907_s16 = scalar_select %p2599_p6, 1, 0 }
  0x56   : > { %s2606_s1 = scalar_select %p48_p0, %s2343_s27, %s50_s29  }
  0x57   : > { %s450_s12 = scalar_lea.hbm %s2863_s0, %s1685_s20  ;;  %s445_s30 = scalar_lea.vmem [#allocation2], %s1684_s3 }
  0x58   : > { %s452_s25 = sshll.u32 %s445_s30, 4  ;;  %p2613_p2 = pnand %p1983_p13, %p2580_p5  ;;  %s453_s25 = int_to_ptr.vmem [resolvable:$true] %s452_s25 }
  0x59   : > { %s442_s24 = scalar_lea.sflag [#allocation3], %s441_s13  ;;  %s2244_s11 = scalar_lea.vmem %s453_s25, 128 }
  0x5a   : > { %p2233_p4 = pneg %p2613_p2  ;;  %p2245_p7 = scmp.ne.s32.totalorder %s453_s25, %s2244_s11 }
  0x5b   : > { %s2371_s29 = smov [#allocation2]  }
  0x5c   : > { %p2247_p8 = pnand %p2245_p7, %p2233_p4  ;;  %s2249_s14 = sshll.u32 %s2371_s29, 4  ;;  %s2250_s14 = int_to_ptr.vmem [resolvable:$false] %s2249_s14 }
  0x5d   : > { %s2251_s5 = scalar_lea.vmem %s2250_s14, 256  ;;  %p2252_p12 = scmp.lt.s32.totalorder %s453_s25, %s2250_s14 }
  0x5e   : > { %p2248_p9 = pneg %p2247_p8  ;;  %p2253_p0 = scmp.lt.s32.totalorder %s2251_s5, %s2244_s11 }
  0x60   : > { %p2254_p6 = por %p2253_p0, %p2252_p12 }
  0x62   : > { %p2255_p5 = pnand %p2254_p6, %p2248_p9 }
  0x64   : > { %2258 = shalt.err (!%p2255_p5)
}
  0x65   : > { %1974 = dma.hbm_to_vmem [thread:$0]  (!%p2613_p2), %s450_s12, 128, %s453_s25, %s442_s24  }
  0x66   : > { %461 = sbr.rel (%p2508_p3) target bundleno = 4062 (0xfde), region = 72  ;;  %s2624_s3 = sand.u32 (!%p2508_p3), 1, %s2339_s26  }
  0x67   : > { %s1687_s7 = sshll.u32 (!%p2508_p3), %s2624_s3, 3  ;;  %s464_s30 = scalar_lea.sflag (!%p2508_p3), [#allocation3], %s2624_s3 }
  0x68   : > { %s467_s19 = scalar_lea.vmem (!%p2508_p3), [#allocation2], %s1687_s7 }
  0x6b   : > { %2318 = dma.done.wait (%p2586_p10), %s464_s30, 128  }
  0x6c   : > { %2320 = vsyncadd (%p2586_p10), %s464_s30, 4294967168 }
  0x6d   : > { %2322 = dma.done.wait (%p2503_p1), [#allocation6], 4096  }
  0x6e   : > { %2324 = vsyncadd (%p2503_p1), [#allocation6], 4294963200 }
  0x6f   : > { %2326 = dma.done.wait (%p2503_p1), [#allocation9], 4096  }
  0x70   : > { %2328 = vsyncadd (%p2503_p1), [#allocation9], 4294963200  ;;  %s2640_s25 = scalar_lea.vmem [#allocation11], %s1687_s7  ;;  %p1693_p3 = scmp.ne.s32.totalorder %s2347_s28, 0 }
  0x72   : > { %530 = sbr.rel (%p1693_p3) target bundleno = 121 (0x79), region = 96 }
  0x77   : > { %v531_v0 = vld [vmem:[%s467_s19] sm:$0xff] }
  0x78   : > { %532 = vst [vmem:[%s2640_s25] sm:$0xff] %v531_v0 }
  0x79 PF: > { %s2645_s14 = sshll.u32 %s2347_s28, 6  ;;  %v2372_v1 = vmov 0.0   ;;  %vm2373_vm0 = vmmov 0   ;;  %s557_s11 = scalar_lea.vmem %s2865_s2, %s2347_s28  ;;  %vm657_vm1 = vcmask 64512   ;;  %vm721_vm2 = vcmask 1043456  }
  0x7a   : > { %1810 = vmatprep.subr.bf16.mxu0 %v2372_v1  ;;  %1826 = vmatprep.mubr.msk.bf16.mxu0 %vm2373_vm0, %v2372_v1  ;;  %s540_s17 = scalar_lea.vmem [#allocation5], %s2645_s14  ;;  %v1696_v12 = vld [vmem:[%s557_s11] ss:$0 sm:$0xff]  ;;  %s2374_s22 = smov 64   ;;  %vm1108_vm3 = vcmask 130048   ;;  %vm1110_vm4 = vcmask 195584  }
  0x7b   : > { %v2075_v2 = vld [vmem:[%s540_s17 + $0x38] sm:$0xff]   ;;  %1830 = vmatprep.subr.bf16.mxu1 %v2372_v1  ;;  %1832 = vmatprep.mubr.msk.bf16.mxu1 %vm2373_vm0, %v2372_v1  ;;  %v2076_v3 = vld [vmem:[%s540_s17 + $0x30] sm:$0xff]   ;;  %v2077_v4 = vld [vmem:[%s540_s17 + $0x28] sm:$0xff]   ;;  %s2375_s13 = smov 96   ;;  %s2376_s20 = smov 56   ;;  %vm1112_vm5 = vcmask 261120  }
  0x7c   : > { %1811 = vmatpush3.bf16.msra.mxu0 %v2075_v2  ;;  %v2078_v5 = vld [vmem:[%s540_s17 + $0x20] sm:$0xff]   ;;  %v2079_v6 = vld [vmem:[%s540_s17 + $0x18] sm:$0xff]   ;;  %v2080_v7 = vld [vmem:[%s540_s17 + $0x10] sm:$0xff]   ;;  %s2377_s21 = smov 88   ;;  %s2378_s24 = smov 120  }
  0x7d   : > { %1812 = vmatprep.subr.bf16.mxu0 %v2372_v1  ;;  %v2081_v8 = vld [vmem:[%s540_s17 + $0x8] sm:$0xff]   ;;  %v2082_v9 = vld [vmem:[%s540_s17] sm:$0xff]   ;;  %s2379_s29 = smov 80   ;;  %s2380_s5 = smov 112   ;;  %vm1723_vm6 = vmpackc.low %vm1112_vm5, %vm1112_vm5 }
  0x7e   : > { %s2381_s7 = smov 48   ;;  %s2382_s30 = smov 72  }
  0x7f   : > { %v2661_v10 = vld [vmem:[%s2640_s25] sm:$0xff]  ;;  %s2383_s19 = smov 104   ;;  %s2384_s17 = smov 40  }
  0x80   : > { %1813 = vmatpush3.bf16.msra.mxu0 %v2076_v3  ;;  %v537_v11 = vpack.c.bf16 %v2661_v10, %v2661_v10  ;;  %s2385_s18 = smov 8   ;;  %s2386_s12 = smov 16  }
  0x81   : > { %1814 = vmatprep.subr.bf16.mxu0 %v2372_v1  ;;  %s1116_s11 = scalar_lea.vmem [#allocation7], %s2645_s14 }
  0x84   : > { %1815 = vmatpush3.bf16.msra.mxu0 %v2077_v4 }
  0x85   : > { %1816 = vmatprep.subr.bf16.mxu0 %v2372_v1 }
  0x88   : > { %1817 = vmatpush3.bf16.msra.mxu0 %v2078_v5 }
  0x89   : > { %1818 = vmatprep.subr.bf16.mxu0 %v2372_v1 }
  0x8c   : > { %1819 = vmatpush3.bf16.msra.mxu0 %v2079_v6 }
  0x8d   : > { %1820 = vmatprep.subr.bf16.mxu0 %v2372_v1 }
  0x90   : > { %1821 = vmatpush3.bf16.msra.mxu0 %v2080_v7 }
  0x91   : > { %1822 = vmatprep.subr.bf16.mxu0 %v2372_v1 }
  0x94   : > { %1823 = vmatpush3.bf16.msra.mxu0 %v2081_v8 }
  0x95   : > { %1824 = vmatprep.subr.bf16.mxu0 %v2372_v1 }
  0x98   : > { %1825 = vmatpush3.bf16.msra.mxu0 %v2082_v9 }
  0x99   : > { %1878 = vmatprep.subr.bf16.mxu0 %v2372_v1 }
  0x9b   : > { %1827 = vmatmul.mubr.bf16.vlgmr.msra.gmra.mxu0 %v537_v11 }
  0x9c   : > { %1894 = vmatprep.mubr.msk.bf16.mxu0 %vm2373_vm0, %v2372_v1 }
 0x15b   : > { %v647_v13 = vpop.f32.mrf.mxu0 }
 0x15c   : > { %v648_v14 = vadd.f32 %v1696_v12, %v647_v13 }
 0x15d   : > { %v1828_v15 = vpop.f32.mrf.mxu0 }
 0x15e   : > { %v2673_v16 = vpack.c.bf16 %v648_v14, %v648_v14 }
 0x15f   : > { %v650_v17 = vpop.f32.mrf.mxu0 }
 0x160   : > { %716 = vrot.lane.b32.xlu1 %v2673_v16, %s2374_s22  ;;  %655 = vrot.lane.b32.xlu0 %v2673_v16, %s2375_s13  ;;  %s2387_s22 = smov 24   ;;  %s2912_s13 = sld [smem:[#allocation28_spill]] }
 0x161   : > { %v1829_v18 = vpop.f32.mrf.mxu0 }
 0x1d2   : > { %v656_v19 = vpop.permute.xlu0 %655  ;;  %v717_v21 = vpop.permute.xlu1 %716 }
 0x1d3   : > { %v662_v20 = vsel %vm657_vm1, %v656_v19, 0  ;;  %v723_v22 = vsel %vm721_vm2, %v717_v21, 0 }
 0x1d4   : > { %1831 = vmatpush3.bf16.xpose.msra.mxu1 %v662_v20 }
 0x1d5   : > { %1836 = vmatprep.subr.bf16.mxu1 %v2372_v1 }
 0x1db   : > { %1833 = vmatmul.mubr.msk.bf16.vlgmr.msra.gmra.mxu1 %vm657_vm1, %v2673_v16 }
 0x1dc   : > { %1837 = vmatpush3.bf16.msra.mxu1 %v723_v22  ;;  %1838 = vmatprep.mubr.msk.bf16.mxu1 %vm2373_vm0, %v2372_v1 }
 0x1dd   : > { %1842 = vmatprep.subr.bf16.mxu1 %v2372_v1 }
 0x29b   : > { %v698_v23 = vpop.f32.mrf.mxu1 }
 0x29c   : > { %v704_v24 = vsel %vm657_vm1, %v698_v23, -inf }
 0x29d   : > { %705 = vmax.xlane.f32.xlu0 %v704_v24  ;;  %v1834_v25 = vpop.f32.mrf.mxu1 }
 0x29f   : > { %v701_v26 = vpop.f32.mrf.mxu1 }
 0x2a1   : > { %v1835_v27 = vpop.f32.mrf.mxu1 }
 0x2b3   : > { %827 = vrot.lane.b32.xlu0 %v2673_v16, %s2376_s20  ;;  %s1398_s20 = scalar_lea.vmem %s2871_s8, %s2347_s28 }
 0x326   : > { %v706_v28 = vpop.xlane.xlu0 %705 }
 0x327   : > { %v707_v29 = vsub.f32 %v698_v23, %v706_v28 }
 0x329   : > { %v708_v30 = vmul.f32 1.442695, %v707_v29 }
 0x32a   : > { %v828_v39 = vpop.permute.xlu0 %827 }
 0x32b   : > { %2107 = vpow2.f32 %v708_v30  ;;  %v833_v41 = vsel %vm721_vm2, %v828_v39, 0 }
 0x338   : > { %v2108_v31 = vpop.eup %2107 }
 0x339   : > { %v710_v32 = vsel %vm657_vm1, %v2108_v31, 0.0 }
 0x33a   : > { %711 = vadd.xlane.f32.xlu1 %v710_v32 }
 0x34b   : > { %767 = vrot.lane.b32.xlu1 %v2673_v16, %s2377_s21  ;;  %s1133_s21 = scalar_lea.vmem %s2867_s4, %s2347_s28 }
 0x34f   : > { %765 = vrot.lane.b32.xlu1 %v2673_v16, %s2378_s24  ;;  %s1265_s24 = scalar_lea.vmem [#allocation8], %s2645_s14 }
 0x3c3   : > { %v712_v33 = vpop.xlane.xlu1 %711 }
 0x3c4   : > { %2109 = vrcp.f32 %v712_v33 }
 0x3c7   : > { %v768_v36 = vpop.permute.xlu1 %767 }
 0x3c8   : > { %v773_v38 = vsel %vm657_vm1, %v768_v36, 0 }
 0x3cb   : > { %v766_v40 = vpop.permute.xlu1 %765 }
 0x3d1   : > { %v2110_v34 = vpop.eup %2109 }
 0x3d2   : > { %v714_v35 = vmul.f32 %v2110_v34, %v2108_v31 }
 0x3d4   : > { %v715_v37 = vpack.c.bf16 %v714_v35, %v714_v35 }
 0x3d6   : > { %1839 = vmatmul.mubr.msk.bf16.vlgmr.msra.gmra.mxu1 %vm657_vm1, %v715_v37 }
 0x3d7   : > { %1843 = vmatpush3.bf16.xpose.msra.mxu1 %v773_v38  ;;  %1844 = vmatprep.mubr.msk.bf16.mxu1 %vm2373_vm0, %v2372_v1 }
 0x3d8   : > { %1848 = vmatprep.subr.bf16.mxu1 %v2372_v1 }
 0x3de   : > { %1845 = vmatmul.mubr.msk.bf16.vlgmr.msra.gmra.mxu1 %vm657_vm1, %v766_v40 }
 0x3df   : > { %1849 = vmatpush3.bf16.msra.mxu1 %v833_v41  ;;  %1850 = vmatprep.mubr.msk.bf16.mxu1 %vm2373_vm0, %v2372_v1 }
 0x3e0   : > { %1854 = vmatprep.subr.bf16.mxu1 %v2372_v1 }
 0x496   : > { %v2700_v42 = vpop.f32.mrf.mxu1 }
 0x498   : > { %v1840_v43 = vpop.f32.mrf.mxu1 }
 0x49a   : > { %v762_v44 = vpop.f32.mrf.mxu1 }
 0x49c   : > { %v1841_v45 = vpop.f32.mrf.mxu1 }
 0x49e   : > { %v809_v46 = vpop.f32.mrf.mxu1 }
 0x49f   : > { %v815_v47 = vsel %vm657_vm1, %v809_v46, -inf }
 0x4a0   : > { %816 = vmax.xlane.f32.xlu1 %v815_v47  ;;  %v1846_v48 = vpop.f32.mrf.mxu1  ;;  %v2085_v47 = vld [vmem:[%s1116_s11 + $0x28] sm:$0xff]  }
 0x4a1   : > { %v2086_v48 = vld [vmem:[%s1116_s11 + $0x20] sm:$0xff]  }
 0x4a2   : > { %v812_v49 = vpop.f32.mrf.mxu1 }
 0x4a3   : > { %v2087_v49 = vld [vmem:[%s1116_s11 + $0x18] sm:$0xff]  }
 0x4a4   : > { %v1847_v50 = vpop.f32.mrf.mxu1 }
 0x4a5   : > { %v2088_v50 = vld [vmem:[%s1116_s11 + $0x10] sm:$0xff]  }
 0x529   : > { %v817_v51 = vpop.xlane.xlu1 %816 }
 0x52a   : > { %v818_v52 = vsub.f32 %v809_v46, %v817_v51  ;;  %v2084_v46 = vld [vmem:[%s1116_s11 + $0x30] sm:$0xff]   ;;  %v2089_v51 = vld [vmem:[%s1116_s11 + $0x8] sm:$0xff]  }
 0x52c   : > { %v819_v53 = vmul.f32 1.442695, %v818_v52  ;;  %v2090_v52 = vld [vmem:[%s1116_s11] sm:$0xff]  }
 0x52e   : > { %2111 = vpow2.f32 %v819_v53 }
 0x53b   : > { %v2112_v54 = vpop.eup %2111 }
 0x53c   : > { %v821_v55 = vsel %vm657_vm1, %v2112_v54, 0.0 }
 0x53d   : > { %822 = vadd.xlane.f32.xlu0 %v821_v55 }
 0x553   : > { %877 = vrot.lane.b32.xlu0 %v2673_v16, %s2379_s29  ;;  %s2771_s29 = scalar_lea.vmem [#allocation10], %s2645_s14  ;;  %s2910_s14 = sld [smem:[#allocation26_spill]] }
 0x557   : > { %875 = vrot.lane.b32.xlu0 %v2673_v16, %s2380_s5 }
 0x559   : > { %s1495_s5 = scalar_lea.vmem %s2910_s14, %s2347_s28 }
 0x5c6   : > { %v823_v56 = vpop.xlane.xlu0 %822 }
 0x5c7   : > { %2113 = vrcp.f32 %v823_v56 }
 0x5ca   : > { %v878_v59 = vpop.permute.xlu0 %877 }
 0x5cb   : > { %v883_v61 = vsel %vm657_vm1, %v878_v59, 0 }
 0x5ce   : > { %v876_v62 = vpop.permute.xlu0 %875 }
 0x5d4   : > { %v2114_v57 = vpop.eup %2113 }
 0x5d5   : > { %v825_v58 = vmul.f32 %v2114_v57, %v2112_v54 }
 0x5d7   : > { %v826_v60 = vpack.c.bf16 %v825_v58, %v825_v58 }
 0x5d9   : > { %1851 = vmatmul.mubr.msk.bf16.vlgmr.msra.gmra.mxu1 %vm657_vm1, %v826_v60 }
 0x5da   : > { %1855 = vmatpush3.bf16.xpose.msra.mxu1 %v883_v61  ;;  %1856 = vmatprep.mubr.msk.bf16.mxu1 %vm2373_vm0, %v2372_v1 }
 0x5db   : > { %1860 = vmatprep.subr.bf16.mxu1 %v2372_v1 }
 0x5e1   : > { %1857 = vmatmul.mubr.msk.bf16.vlgmr.msra.gmra.mxu1 %vm657_vm1, %v876_v62 }
 0x5e2   : > { %1862 = vmatprep.mubr.msk.bf16.mxu1 %vm2373_vm0, %v2372_v1 }
 0x699   : > { %v869_v63 = vpop.f32.mrf.mxu1 }
 0x69b   : > { %v1852_v0 = vpop.f32.mrf.mxu1 }
 0x69c   : > { %v534_v0 = vlaneseq }
 0x69d   : > { %v872_v2 = vpop.f32.mrf.mxu1 }
 0x69e   : > { %v1714_v2 = vld [vmem:[%s1133_s21] ss:$0 sm:$0xff]  ;;  %s2909_s21 = sld [smem:[#allocation17_spill]] }
 0x69f   : > { %v1853_v3 = vpop.f32.mrf.mxu1 }
 0x6a0   : > { %v2754_v3 = vand.u32 127, %v534_v0 }
 0x6a1   : > { %v919_v4 = vpop.f32.mrf.mxu1 }
 0x6a2   : > { %v925_v5 = vsel %vm657_vm1, %v919_v4, -inf  ;;  %vm536_vm7 = vcmp.lt.s32.totalorder %v2754_v3, 32  ;;  %v1748_v3 = vld [vmem:[%s1495_s5] ss:$0 sm:$0xff] }
 0x6a3   : > { %926 = vmax.xlane.f32.xlu1 %v925_v5  ;;  %v1858_v6 = vpop.f32.mrf.mxu1 }
 0x6a5   : > { %v922_v7 = vpop.f32.mrf.mxu1 }
 0x6a7   : > { %v1859_v8 = vpop.f32.mrf.mxu1 }
 0x6b4   : > { %937 = vrot.lane.b32.xlu1 %v2673_v16, %s2381_s7  ;;  %s1230_s7 = scalar_lea.vmem %s2872_s9, %s2347_s28 }
 0x6b8   : > { %987 = vrot.lane.b32.xlu1 %v2673_v16, %s2382_s30 }
 0x6bc   : > { %985 = vrot.lane.b32.xlu1 %v2673_v16, %s2383_s19  ;;  %s2911_s19 = sld [smem:[#allocation27_spill]] }
 0x72c   : > { %v927_v9 = vpop.xlane.xlu1 %926 }
 0x72d   : > { %v928_v11 = vsub.f32 %v919_v4, %v927_v9 }
 0x72f   : > { %v929_v12 = vmul.f32 1.442695, %v928_v11  ;;  %v2091_v11 = vld [vmem:[%s1265_s24 + $0x38] sm:$0xff]  }
 0x730   : > { %v938_v13 = vpop.permute.xlu1 %937 }
 0x731   : > { %2115 = vpow2.f32 %v929_v12  ;;  %v943_v14 = vsel %vm721_vm2, %v938_v13, 0  ;;  %v2092_v12 = vld [vmem:[%s1265_s24 + $0x30] sm:$0xff]  }
 0x732   : > { %1861 = vmatpush3.bf16.msra.mxu1 %v943_v14 }
 0x733   : > { %1866 = vmatprep.subr.bf16.mxu1 %v2372_v1 }
 0x734   : > { %v988_v21 = vpop.permute.xlu1 %987 }
 0x735   : > { %v993_v23 = vsel %vm657_vm1, %v988_v21, 0  ;;  %v2096_v21 = vld [vmem:[%s1265_s24 + $0x10] sm:$0xff]  }
 0x738   : > { %v986_v24 = vpop.permute.xlu1 %985 }
 0x73e   : > { %v2116_v15 = vpop.eup %2115 }
 0x73f   : > { %v931_v17 = vsel %vm657_vm1, %v2116_v15, 0.0 }
 0x740   : > { %932 = vadd.xlane.f32.xlu0 %v931_v17 }
 0x7c9   : > { %v933_v18 = vpop.xlane.xlu0 %932 }
 0x7ca   : > { %2117 = vrcp.f32 %v933_v18  ;;  %v2093_v18 = vld [vmem:[%s1265_s24 + $0x28] sm:$0xff]  }
 0x7d7   : > { %v2118_v19 = vpop.eup %2117 }
 0x7d8   : > { %v935_v20 = vmul.f32 %v2118_v19, %v2116_v15  ;;  %v2094_v19 = vld [vmem:[%s1265_s24 + $0x20] sm:$0xff]  }
 0x7da   : > { %v936_v22 = vpack.c.bf16 %v935_v20, %v935_v20  ;;  %v2095_v20 = vld [vmem:[%s1265_s24 + $0x18] sm:$0xff]  }
 0x7dc   : > { %1863 = vmatmul.mubr.msk.bf16.vlgmr.msra.gmra.mxu1 %vm657_vm1, %v936_v22  ;;  %v2097_v22 = vld [vmem:[%s1265_s24 + $0x8] sm:$0xff]  }
 0x7dd   : > { %1867 = vmatpush3.bf16.xpose.msra.mxu1 %v993_v23  ;;  %1868 = vmatprep.mubr.msk.bf16.mxu1 %vm2373_vm0, %v2372_v1  ;;  %v2098_v23 = vld [vmem:[%s1265_s24] sm:$0xff]   ;;  %s1528_s24 = scalar_lea.sflag [#allocation4], %s2624_s3 }
 0x7de   : > { %1872 = vmatprep.subr.bf16.mxu1 %v2372_v1 }
 0x7e4   : > { %1869 = vmatmul.mubr.msk.bf16.vlgmr.msra.gmra.mxu1 %vm657_vm1, %v986_v24  ;;  %v2099_v24 = vld [vmem:[%s2771_s29 + $0x38] sm:$0xff]  }
 0x7e5   : > { %1874 = vmatprep.mubr.msk.bf16.mxu1 %vm2373_vm0, %v2372_v1 }
 0x89c   : > { %v979_v25 = vpop.f32.mrf.mxu1 }
 0x89e   : > { %v1864_v26 = vpop.f32.mrf.mxu1 }
 0x89f   : > { %v2101_v26 = vld [vmem:[%s2771_s29 + $0x28] sm:$0xff]  }
 0x8a0   : > { %v982_v27 = vpop.f32.mrf.mxu1 }
 0x8a1   : > { %v2102_v27 = vld [vmem:[%s2771_s29 + $0x20] sm:$0xff]  }
 0x8a2   : > { %v1865_v28 = vpop.f32.mrf.mxu1 }
 0x8a3   : > { %v2103_v28 = vld [vmem:[%s2771_s29 + $0x18] sm:$0xff]  }
 0x8a4   : > { %v1029_v29 = vpop.f32.mrf.mxu1 }
 0x8a5   : > { %v1035_v30 = vsel %vm657_vm1, %v1029_v29, -inf }
 0x8a6   : > { %1036 = vmax.xlane.f32.xlu1 %v1035_v30  ;;  %v1870_v31 = vpop.f32.mrf.mxu1 }
 0x8a8   : > { %v1032_v32 = vpop.f32.mrf.mxu1 }
 0x8aa   : > { %v1871_v33 = vpop.f32.mrf.mxu1 }
 0x92f   : > { %v1037_v34 = vpop.xlane.xlu1 %1036 }
 0x930   : > { %v1038_v35 = vsub.f32 %v1029_v29, %v1037_v34  ;;  %v2104_v29 = vld [vmem:[%s2771_s29 + $0x10] sm:$0xff]   ;;  %v1726_v34 = vld [vmem:[%s1230_s7] ss:$0 sm:$0xff] }
 0x932   : > { %v1039_v36 = vmul.f32 1.442695, %v1038_v35 }
 0x934   : > { %2119 = vpow2.f32 %v1039_v36 }
 0x941   : > { %v2120_v37 = vpop.eup %2119 }
 0x942   : > { %v1041_v38 = vsel %vm657_vm1, %v2120_v37, 0.0 }
 0x943   : > { %1042 = vadd.xlane.f32.xlu0 %v1041_v38 }
 0x959   : > { %1047 = vrot.lane.b32.xlu0 %v2673_v16, %s2384_s17  ;;  %v2083_v16 = vld [vmem:[%s1116_s11 + $0x38] sm:$0xff]   ;;  %s1232_s17 = scalar_lea.vmem %s2873_s10, %s2347_s28  ;;  %s1282_s11 = scalar_lea.vmem %s2869_s6, %s2347_s28 }
 0x95a   : > { %1879 = vmatpush3.bf16.msra.mxu0 %v2083_v16  ;;  %v1727_v36 = vld [vmem:[%s1232_s17] ss:$0 sm:$0xff]  ;;  %s1497_s17 = scalar_lea.vmem %s2911_s19, %s2347_s28  ;;  %s2388_s28 = smov [#allocation11]  }
 0x95b   : > { %1880 = vmatprep.subr.bf16.mxu0 %v2372_v1  ;;  %s2263_s14 = sshll.u32 %s2388_s28, 4  ;;  %s2264_s14 = int_to_ptr.vmem [resolvable:$false] %s2263_s14 }
 0x95c   : > { %s2265_s5 = scalar_lea.vmem %s2264_s14, 256 }
 0x95d   : > { %1096 = vrot.lane.b32.xlu0 %v869_v63, %s2385_s18  ;;  %s1751_s18 = sshll.u32 %s2909_s21, 7 }
 0x95e   : > { %1881 = vmatpush3.bf16.msra.mxu0 %v2084_v46 }
 0x95f   : > { %1882 = vmatprep.subr.bf16.mxu0 %v2372_v1 }
 0x961   : > { %1100 = vrot.lane.b32.xlu0 %v979_v25, %s2386_s12  ;;  %v2100_v25 = vld [vmem:[%s2771_s29 + $0x30] sm:$0xff]   ;;  %s1541_s12 = sshll.u32 %s2640_s25, 4  ;;  %s1542_s12 = int_to_ptr.vmem [resolvable:$true] %s1541_s12 }
 0x962   : > { %1883 = vmatpush3.bf16.msra.mxu0 %v2085_v47  ;;  %p2266_p6 = scmp.lt.s32.totalorder %s1542_s12, %s2264_s14 }
 0x963   : > { %1884 = vmatprep.subr.bf16.mxu0 %v2372_v1 }
 0x966   : > { %1885 = vmatpush3.bf16.msra.mxu0 %v2086_v48 }
 0x967   : > { %1886 = vmatprep.subr.bf16.mxu0 %v2372_v1 }
 0x96a   : > { %1887 = vmatpush3.bf16.msra.mxu0 %v2087_v49 }
 0x96b   : > { %1888 = vmatprep.subr.bf16.mxu0 %v2372_v1 }
 0x96e   : > { %1889 = vmatpush3.bf16.msra.mxu0 %v2088_v50 }
 0x96f   : > { %1890 = vmatprep.subr.bf16.mxu0 %v2372_v1 }
 0x972   : > { %1891 = vmatpush3.bf16.msra.mxu0 %v2089_v51 }
 0x973   : > { %1892 = vmatprep.subr.bf16.mxu0 %v2372_v1 }
 0x976   : > { %1893 = vmatpush3.bf16.msra.mxu0 %v2090_v52 }
 0x977   : > { %1918 = vmatprep.subr.bf16.mxu0 %v2372_v1 }
 0x9cc   : > { %v1043_v39 = vpop.xlane.xlu0 %1042 }
 0x9cd   : > { %2121 = vrcp.f32 %v1043_v39 }
 0x9d0   : > { %v1048_v40 = vpop.permute.xlu0 %1047 }
 0x9d1   : > { %v1053_v41 = vsel %vm721_vm2, %v1048_v40, 0  ;;  %v2105_v40 = vld [vmem:[%s2771_s29 + $0x8] sm:$0xff]  }
 0x9d2   : > { %1873 = vmatpush3.bf16.msra.mxu1 %v1053_v41  ;;  %v2106_v41 = vld [vmem:[%s2771_s29] sm:$0xff]   ;;  %s2259_s29 = scalar_lea.vmem %s1542_s12, 128 }
 0x9d3   : > { %1898 = vmatprep.subr.bf16.mxu1 %v2372_v1  ;;  %p2260_p1 = scmp.ne.s32.totalorder %s1542_s12, %s2259_s29  ;;  %p2267_p2 = scmp.lt.s32.totalorder %s2265_s5, %s2259_s29 }
 0x9d4   : > { %v1097_v57 = vpop.permute.xlu0 %1096 }
 0x9d5   : > { %v1107_v59 = vsel %vm657_vm1, %v2700_v42, %v1097_v57  ;;  %p2261_p10 = pnand %p2260_p1, %p2592_p11  ;;  %p2268_p4 = por %p2267_p2, %p2266_p6 }
 0x9d7   : > { %p2262_p13 = pneg %p2261_p10 }
 0x9d8   : > { %v1101_v58 = vpop.permute.xlu0 %1100 }
 0x9d9   : > { %v1109_v60 = vsel %vm1108_vm3, %v1107_v59, %v1101_v58  ;;  %p2269_p7 = pnand %p2268_p4, %p2262_p13 }
 0x9da   : > { %v2122_v43 = vpop.eup %2121 }
 0x9db   : > { %v1045_v44 = vmul.f32 %v2122_v43, %v2120_v37  ;;  %v1729_v43 = vld [vmem:[%s1282_s11] ss:$0 sm:$0xff] }
 0x9dd   : > { %v1046_v45 = vpack.c.bf16 %v1045_v44, %v1045_v44 }
 0x9df   : > { %1875 = vmatmul.mubr.msk.bf16.vlgmr.msra.gmra.mxu1 %vm657_vm1, %v1046_v45 }
 0x9e0   : > { %1914 = vmatprep.mubr.msk.bf16.mxu1 %vm2373_vm0, %v2372_v1  ;;  %1899 = vmatpush3.bf16.msra.mxu1 %v2091_v11 }
 0x9e1   : > { %1900 = vmatprep.subr.bf16.mxu1 %v2372_v1 }
 0x9e4   : > { %1901 = vmatpush3.bf16.msra.mxu1 %v2092_v12 }
 0x9e5   : > { %1902 = vmatprep.subr.bf16.mxu1 %v2372_v1 }
 0x9e8   : > { %1903 = vmatpush3.bf16.msra.mxu1 %v2093_v18 }
 0x9e9   : > { %1904 = vmatprep.subr.bf16.mxu1 %v2372_v1 }
 0x9ec   : > { %1905 = vmatpush3.bf16.msra.mxu1 %v2094_v19 }
 0x9ed   : > { %1906 = vmatprep.subr.bf16.mxu1 %v2372_v1 }
 0x9f0   : > { %1907 = vmatpush3.bf16.msra.mxu1 %v2095_v20 }
 0x9f1   : > { %1908 = vmatprep.subr.bf16.mxu1 %v2372_v1 }
 0x9f4   : > { %1909 = vmatpush3.bf16.msra.mxu1 %v2096_v21 }
 0x9f5   : > { %1910 = vmatprep.subr.bf16.mxu1 %v2372_v1 }
 0x9f8   : > { %1911 = vmatpush3.bf16.msra.mxu1 %v2097_v22 }
 0x9f9   : > { %1912 = vmatprep.subr.bf16.mxu1 %v2372_v1 }
 0x9fc   : > { %1913 = vmatpush3.bf16.msra.mxu1 %v2098_v23 }
 0xa9f   : > { %v1089_v53 = vpop.f32.mrf.mxu1 }
 0xaa0   : > { %1104 = vrot.lane.b32.xlu1 %v1089_v53, %s2387_s22 }
 0xaa1   : > { %v1876_v54 = vpop.f32.mrf.mxu1 }
 0xaa3   : > { %v1092_v55 = vpop.f32.mrf.mxu1 }
 0xaa5   : > { %v1877_v56 = vpop.f32.mrf.mxu1 }
 0xb12   : > { %v1105_v61 = vpop.permute.xlu1 %1104 }
 0xb13   : > { %v1111_v62 = vsel %vm1110_vm4, %v1109_v60, %v1105_v61 }
 0xb14   : > { %v1724_v63 = vpack.c.bf16 %v1111_v62, %v1111_v62 }
 0xb16   : > { %1895 = vmatmul.mubr.msk.bf16.vlgmr.msra.gmra.mxu0 %vm1723_vm6, %v1724_v63 }
 0xb17   : > { %1934 = vmatprep.mubr.msk.bf16.mxu0 %vm2373_vm0, %v2372_v1  ;;  %1919 = vmatpush3.bf16.msra.mxu0 %v2099_v24 }
 0xb18   : > { %1920 = vmatprep.subr.bf16.mxu0 %v2372_v1 }
 0xb1b   : > { %1921 = vmatpush3.bf16.msra.mxu0 %v2100_v25 }
 0xb1c   : > { %1922 = vmatprep.subr.bf16.mxu0 %v2372_v1 }
 0xb1f   : > { %1923 = vmatpush3.bf16.msra.mxu0 %v2101_v26 }
 0xb20   : > { %1924 = vmatprep.subr.bf16.mxu0 %v2372_v1 }
 0xb23   : > { %1925 = vmatpush3.bf16.msra.mxu0 %v2102_v27 }
 0xb24   : > { %1926 = vmatprep.subr.bf16.mxu0 %v2372_v1 }
 0xb27   : > { %1927 = vmatpush3.bf16.msra.mxu0 %v2103_v28 }
 0xb28   : > { %1928 = vmatprep.subr.bf16.mxu0 %v2372_v1 }
 0xb2b   : > { %1929 = vmatpush3.bf16.msra.mxu0 %v2104_v29 }
 0xb2c   : > { %1930 = vmatprep.subr.bf16.mxu0 %v2372_v1 }
 0xb2f   : > { %1931 = vmatpush3.bf16.msra.mxu0 %v2105_v40 }
 0xb30   : > { %1932 = vmatprep.subr.bf16.mxu0 %v2372_v1  ;;  %v1739_v1 = vld [vmem:[%s1398_s20] ss:$0 sm:$0xff]  ;;  %s1539_s20 = scalar_lea.hbm %s2912_s13, %s1751_s18 }
 0xb33   : > { %1933 = vmatpush3.bf16.msra.mxu0 %v2106_v41 }
 0xbd6   : > { %v1223_v4 = vpop.f32.mrf.mxu0 }
 0xbd7   : > { %v1224_v42 = vadd.f32 %v1714_v2, %v1223_v4 }
 0xbd8   : > { %v1896_v5 = vpop.f32.mrf.mxu0 }
 0xbd9   : > { %v1229_v6 = vadd.f32 %v1224_v42, %v2661_v10  ;;  %v1749_v42 = vld [vmem:[%s1497_s17] ss:$0 sm:$0xff] }
 0xbda   : > { %v1226_v7 = vpop.f32.mrf.mxu0 }
 0xbdb   : > { %v1236_v8 = vsel %vm536_vm7, %v1229_v6, 0.0 }
 0xbdc   : > { %1237 = vadd.xlane.f32.xlu0 %v1236_v8  ;;  %v1897_v9 = vpop.f32.mrf.mxu0 }
 0xc65   : > { %v1238_v13 = vpop.xlane.xlu0 %1237 }
 0xc66   : > { %v1239_v14 = vmul.f32 0.03125, %v1238_v13 }
 0xc68   : > { %v1240_v15 = vsub.f32 %v1229_v6, %v1239_v14 }
 0xc6a   : > { %v1241_v10 = vsel %vm536_vm7, %v1240_v15, 0.0 }
 0xc6b   : > { %v1242_v17 = vmul.f32 %v1241_v10, %v1241_v10 }
 0xc6d   : > { %1243 = vadd.xlane.f32.xlu1 %v1242_v17 }
 0xcf6   : > { %v1244_v30 = vpop.xlane.xlu1 %1243 }
 0xcf7   : > { %v1245_v31 = vmul.f32 0.03125, %v1244_v30 }
 0xcf9   : > { %v1246_v32 = vadd.f32 1e-05, %v1245_v31 }
 0xcfb   : > { %2123 = vrsqrt.f32 %v1246_v32 }
 0xd08   : > { %v2124_v33 = vpop.eup %2123 }
 0xd09   : > { %v1248_v35 = vmul.f32 %v2124_v33, %v1241_v10 }
 0xd0b   : > { %v1255_v37 = vmul.f32 %v1726_v34, %v1248_v35 }
 0xd0d   : > { %v1262_v38 = vadd.f32 %v1727_v36, %v1255_v37 }
 0xd0f   : > { %v1263_v39 = vpack.c.bf16 %v1262_v38, %v1262_v38 }
 0xd11   : > { %1915 = vmatmul.mubr.bf16.vlgmr.msra.gmra.mxu1 %v1263_v39 }
 0xdd1   : > { %v1372_v44 = vpop.f32.mrf.mxu1 }
 0xdd2   : > { %v1373_v45 = vadd.f32 %v1729_v43, %v1372_v44 }
 0xdd3   : > { %v1916_v16 = vpop.f32.mrf.mxu1 }
 0xdd4   : > { %v1378_v46 = vmax.f32 %v1373_v45, 0.0 }
 0xdd5   : > { %v1375_v47 = vpop.f32.mrf.mxu1 }
 0xdd6   : > { %v1379_v48 = vpack.c.bf16 %v1378_v46, %v1378_v46 }
 0xdd7   : > { %v1917_v49 = vpop.f32.mrf.mxu1 }
 0xdd8   : > { %1935 = vmatmul.mubr.bf16.vlgmr.msra.gmra.mxu0 %v1379_v48 }
 0xe98   : > { %v1488_v50 = vpop.f32.mrf.mxu0 }
 0xe99   : > { %v1489_v51 = vadd.f32 %v1739_v1, %v1488_v50 }
 0xe9a   : > { %v1936_v52 = vpop.f32.mrf.mxu0 }
 0xe9b   : > { %v1494_v53 = vadd.f32 %v1489_v51, %v1262_v38 }
 0xe9c   : > { %v1491_v54 = vpop.f32.mrf.mxu0 }
 0xe9d   : > { %v1499_v55 = vsel %vm536_vm7, %v1494_v53, 0.0 }
 0xe9e   : > { %1500 = vadd.xlane.f32.xlu0 %v1499_v55  ;;  %v1937_v56 = vpop.f32.mrf.mxu0 }
 0xf27   : > { %v1501_v57 = vpop.xlane.xlu0 %1500 }
 0xf28   : > { %v1502_v58 = vmul.f32 0.03125, %v1501_v57 }
 0xf2a   : > { %v1503_v59 = vsub.f32 %v1494_v53, %v1502_v58 }
 0xf2c   : > { %v1504_v60 = vsel %vm536_vm7, %v1503_v59, 0.0 }
 0xf2d   : > { %v1505_v61 = vmul.f32 %v1504_v60, %v1504_v60 }
 0xf2f   : > { %1506 = vadd.xlane.f32.xlu0 %v1505_v61 }
 0xfb8   : > { %v1507_v62 = vpop.xlane.xlu0 %1506 }
 0xfb9   : > { %v1508_v63 = vmul.f32 0.03125, %v1507_v62 }
 0xfbb   : > { %v1509_v0 = vadd.f32 1e-05, %v1508_v63 }
 0xfbd   : > { %2125 = vrsqrt.f32 %v1509_v0 }
 0xfca   : > { %v2126_v2 = vpop.eup %2125 }
 0xfcb   : > { %v1511_v4 = vmul.f32 %v2126_v2, %v1504_v60 }
 0xfcd   : > { %v1518_v5 = vmul.f32 %v1748_v3, %v1511_v4 }
 0xfcf   : > { %v1525_v6 = vadd.f32 %v1749_v42, %v1518_v5 }
 0xfd1   : > { %1526 = vst [vmem:[%s2640_s25] sm:$0xff] %v1525_v6 }
 0xfd2   : > { %2272 = shalt.err (!%p2269_p7)
}
 0xfd3   : > { %s2273_s21 = scalar_lea.hbm %s1539_s20, 128  ;;  %s2277_s7 = scalar_lea.hbm %s2912_s13, 256 }
 0xfd4   : > { %p2274_p8 = scmp.ne.s32.totalorder %s1539_s20, %s2273_s21  ;;  %p2278_p0 = scmp.lt.s32.totalorder %s1539_s20, %s2912_s13 }
 0xfd5   : > { %p2279_p5 = scmp.lt.s32.totalorder %s2277_s7, %s2273_s21 }
 0xfd6   : > { %p2275_p9 = pnand %p2274_p8, %p2592_p11 }
 0xfd7   : > { %p2280_p3 = por %p2279_p5, %p2278_p0 }
 0xfd8   : > { %p2276_p12 = pneg %p2275_p9 }
 0xfda   : > { %p2281_p1 = pnand %p2280_p3, %p2276_p12 }
 0xfdc   : > { %2284 = shalt.err (!%p2281_p1)
}
 0xfdd   : > { %1956 = dma.vmem_to_hbm [thread:$0]  (%p2592_p11), %s1542_s12, 128, %s1539_s20, %s1528_s24  }
 0xfde PF: > { %s2913_s17 = sld [smem:[#allocation16_spill]]  ;;  %p1988_p10 = scmp.ge.s32.totalorder %s2363_s15, 2 }
 0xfdf   : > { %p2914_p13 = scmp.ne.s32.totalorder %s2907_s16, 0 }
 0xfe1   : > { %p1976_p6 = pnand %p1988_p10, %p2914_p13 }
 0xfe3   : > { %p1977_p2 = pneg %p1976_p6 }
 0xfe4   : > { %s1553_s18 = sand.u32 1, %s2913_s17  }
 0xfe5   : > { %s1554_s11 = scalar_lea.sflag [#allocation4], %s1553_s18 }
 0xfe6   : > { %2330 = dma.done.wait (%p1977_p2), %s1554_s11, 128  }
 0xfe7   : > { %2332 = vsyncadd (%p1977_p2), %s1554_s11, 4294967168  ;;  %s31_s15 = sadd.s32 1, %s2363_s15   ;;  %s2915_s28 = sld [smem:[#allocation18_spill]] }
 0xfe8   : > { %p28_p4 = scmp.ge.s32.totalorder %s31_s15, 6   ;;  %s2916_s29 = sld [smem:[#allocation19_spill]] }
 0xfe9   : > { %s2917_s30 = sld [smem:[#allocation20_spill]]  ;;  %s2919_s25 = smov %s2339_s26 }
 0xfea   : > { %s2918_s14 = sld [smem:[#allocation21_spill]]  ;;  %s2920_s26 = smov %s2343_s27 }
 0xfeb   : > { %s2921_s27 = smov %s2606_s1  ;;  %30 = sbr.rel (!%p28_p4) target bundleno = 17 (0x11), region = 149 }
 0xff0   :  { %1559 = vsyncpa [#allocation3], 1 }
 0xff1   :  { %1561 = vsyncpa [#allocation3 + $0x1], 1 }
 0xff2   :  { %1562 = vsyncpa [#allocation6], 1 }
 0xff3   :  { %1563 = vsyncpa [#allocation9], 1 }
 0xff4   :  { %1564 = vsyncpa [#allocation4], 1 }
 0xff5   :  { %1566 = vsyncpa [#allocation4 + $0x1], 1 }

</bundles_post_ra>
